<compile_context>
chip_gen: v6e
topology: v6e:2x2x1
jax: 0.10.0
libtpu: 0.0.40
codegen_flags: <defaults>
</compile_context>

<pallas_src>
import functools

import jax
import jax.numpy as jnp
import numpy as np
from jax.experimental import pallas as pl
from jax.experimental.pallas import tpu as pltpu  # noqa: F401

# ---------------- model hyper-parameters (small, consistent with the module) --
SEQ = 8          # s
BATCH = 2        # b
INPUT = 4        # input_size
HIDDEN = 32      # hidden_size
OUTPUT = 1       # output_size
NUM_LAYERS = 2
LANE = 128       # lane-dense padding for the FC output slab


# --------------------------- wrapper-side packing ------------------------------
def _interleave_gates(w, layer, H):
    """Scatter a (rows, 4H) gate-ordered [i,f,g,o] matrix into the fused 8H
    layout [i1|i2|f1|f2|g1|g2|o1|o2], filling `layer`'s slots (zeros elsewhere)."""
    out = jnp.zeros((w.shape[0], 8 * H), w.dtype)
    for g in range(4):
        col = (2 * g + layer) * H
        out = out.at[:, col:col + H].set(w[:, g * H:(g + 1) * H])
    return out


def pack_params(params):
    """One-time parameter packing. Call once, OUTSIDE the jitted forward."""
    (w_ih0, w_hh0, b0), (w_ih1, w_hh1, b1) = params["layers"]
    fc_w, fc_b = params["fc_w"], params["fc_b"]
    H = w_hh0.shape[0]
    O = fc_w.shape[1]

    # Hoisted input-projection weight/bias, gate-interleaved.  Layer-2 columns
    # of w0p are zero, so every row of (x @ w0p + bias) carries b1 there.
    w0p = _interleave_gates(w_ih0, 0, H)                                   # (I, 8H)
    bias = _interleave_gates(b0, 0, H) + _interleave_gates(b1, 1, H)       # (1, 8H)

    # Fused recurrent RHS: rows 0:H multiply h1, rows H:2H multiply h2 (bf16
    # MXU operands; f32 accumulation in-kernel).
    rhs = jnp.concatenate(
        [_interleave_gates(w_hh0, 0, H) + _interleave_gates(w_ih1, 1, H),  # h1 rows
         _interleave_gates(w_hh1, 1, H)],                                  # h2 rows
        axis=0).astype(jnp.bfloat16)                                       # (2H, 8H)

    # FC weight padded to 128 output lanes; the h1 half of the state gets zero
    # rows so the FC reads the fused [h1|h2] state directly.
    fc_w2 = jnp.zeros((2 * H, LANE), jnp.float32).at[H:, :O].set(fc_w)
    fc_b2 = jnp.zeros((1, LANE), jnp.float32).at[:, :O].set(fc_b)

    # Mask keeping only the layer-1 half of the fused [h1|h2] / [c1|c2] state.
    l1_mask = jnp.zeros((1, 2 * H), jnp.float32).at[:, :H].set(1.0)

    return {"w0p": w0p, "bias": bias, "rhs": rhs,
            "fc_w2": fc_w2, "fc_b2": fc_b2, "l1_mask": l1_mask}


# ------------------------------- fused forward ---------------------------------
@functools.partial(jax.jit, static_argnames=("out_dim",))
def lstm_forward(x, packed, out_dim=OUTPUT):
    """Full module forward: 2-layer LSTM + Linear, returns (S, B, out_dim)."""
    S, B, I = x.shape
    H = packed["rhs"].shape[0] // 2
    x2d = x.reshape(S * B, I)

    def kernel(x_ref, w0p_ref, bias_ref, rhs_ref, fcw_ref, fcb_ref, l1m_ref,
               out_ref):
        # Hoisted input projection for ALL timesteps (+ b0; layer-2 cols = b1).
        gx = jnp.dot(x_ref[...], w0p_ref[...],
                     preferred_element_type=jnp.float32) + bias_ref[...]
        rhs = rhs_ref[...]            # (2H, 8H) bf16, loaded once
        fcw = fcw_ref[...]            # (2H, LANE) f32
        fcb = fcb_ref[...]            # (1, LANE) f32
        l1m = l1m_ref[...]            # (1, 2H) f32

        hcat = jnp.zeros((B, 2 * H), jnp.float32)   # [h1 | h2]
        ccat = jnp.zeros((B, 2 * H), jnp.float32)   # [c1 | c2]

        # Wavefront: wave w = layer-1 step w + layer-2 step (w-1); their fused
        # pre-activations come from ONE (B,2H)@(2H,8H) bf16 MXU matmul.
        for w in range(S + 1):                       # static -> fully unrolled
            r = min(w, S - 1)                        # gx row block for layer 1
            g8 = gx[r * B:(r + 1) * B, :]            # (B, 8H)
            if w > 0:                                # wave 0: hcat == 0
                g8 = g8 + jnp.dot(hcat.astype(jnp.bfloat16), rhs,
                                  preferred_element_type=jnp.float32)
            sig = jax.nn.sigmoid(g8)                 # one full-width EUP pass
            th = jnp.tanh(g8)                        # one full-width EUP pass
            # Both layers' cell updates in one 2H-wide VPU pass (no lane moves).
            ccat = (sig[:, 2 * H:4 * H] * ccat
                    + sig[:, 0:2 * H] * th[:, 4 * H:6 * H])
            hcat = sig[:, 6 * H:8 * H] * jnp.tanh(ccat)
            if w == 0:
                # Layer-2 "step -1" does not exist: keep only the layer-1 half.
                ccat = ccat * l1m
                hcat = hcat * l1m
            else:
                # FC on h2[w-1]; fcw's h1 rows are zero, so no slicing needed.
                y = jnp.dot(hcat, fcw, preferred_element_type=jnp.float32) + fcb
                out_ref[(w - 1) * B:w * B, :] = y.astype(out_ref.dtype)

    cost = pl.CostEstimate(
        flops=2 * S * B * (I * 8 * H + 2 * H * 8 * H + 2 * H * LANE),
        transcendentals=(S + 1) * B * (2 * 8 * H + 2 * H),
        bytes_accessed=4 * (x2d.size + packed["w0p"].size + packed["bias"].size
                            + packed["fc_w2"].size + packed["fc_b2"].size
                            + packed["l1_mask"].size + S * B * LANE)
        + 2 * packed["rhs"].size)

    y_pad = pl.pallas_call(
        kernel,
        out_shape=jax.ShapeDtypeStruct((S * B, LANE), jnp.float32),
        cost_estimate=cost,
    )(x2d, packed["w0p"], packed["bias"], packed["rhs"],
      packed["fc_w2"], packed["fc_b2"], packed["l1_mask"])

    return y_pad[:, :out_dim].reshape(S, B, out_dim)


# ------------------------------ pure-JAX reference ------------------------------
def lstm_reference(x, params):
    h_in = x
    for (w_ih, w_hh, b) in params["layers"]:
        S, B, _ = h_in.shape
        H = w_hh.shape[0]
        h = jnp.zeros((B, H), jnp.float32)
        c = jnp.zeros((B, H), jnp.float32)
        outs = []
        for t in range(S):
            gates = h_in[t] @ w_ih + h @ w_hh + b
            i = jax.nn.sigmoid(gates[:, 0 * H:1 * H])
            f = jax.nn.sigmoid(gates[:, 1 * H:2 * H])
            g = jnp.tanh(gates[:, 2 * H:3 * H])
            o = jax.nn.sigmoid(gates[:, 3 * H:4 * H])
            c = f * c + i * g
            h = o * jnp.tanh(c)
            outs.append(h)
        h_in = jnp.stack(outs)
    S, B, H = h_in.shape
    y = h_in.reshape(S * B, H) @ params["fc_w"] + params["fc_b"]
    return y.reshape(S, B, -1)


# ------------------------------ parameter init ----------------------------------
def init_params(key):
    """Deterministic synthetic init (uniform(-1/sqrt(H), 1/sqrt(H)) like PyTorch)."""
    bound = 1.0 / np.sqrt(HIDDEN)
    layers = []
    in_size = INPUT
    for _ in range(NUM_LAYERS):
        key, k1, k2, k3 = jax.random.split(key, 4)
        w_ih = jax.random.uniform(k1, (in_size, 4 * HIDDEN), jnp.float32,
                                  -bound, bound)
        w_hh = jax.random.uniform(k2, (HIDDEN, 4 * HIDDEN), jnp.float32,
                                  -bound, bound)
        b = jax.random.uniform(k3, (1, 4 * HIDDEN), jnp.float32, -bound, bound)
        layers.append((w_ih, w_hh, b))
        in_size = HIDDEN
    key, k1, k2 = jax.random.split(key, 3)
    fc_bound = 1.0 / np.sqrt(HIDDEN)
    fc_w = jax.random.uniform(k1, (HIDDEN, OUTPUT), jnp.float32,
                              -fc_bound, fc_bound)
    fc_b = jax.random.uniform(k2, (1, OUTPUT), jnp.float32, -fc_bound, fc_bound)
    return {"layers": layers, "fc_w": fc_w, "fc_b": fc_b}


# ------------------------------ main ---------------------------------------------
if __name__ == "__main__":
    key = jax.random.PRNGKey(0)
    key, kx = jax.random.split(key)
    x = jax.random.normal(kx, (SEQ, BATCH, INPUT), jnp.float32)  # (s, b, input)
    params = init_params(key)
    packed = pack_params(params)          # one-time packing, outside jit

    out = lstm_forward(x, packed, out_dim=OUTPUT)
    out = jax.block_until_ready(out)

    ref = jax.block_until_ready(lstm_reference(x, params))
    assert out.shape == (SEQ, BATCH, OUTPUT), out.shape
    # The recurrent matmul uses bf16 MXU operands (f32 accumulation), so the
    # tolerance vs the all-f32 reference is loosened per the perf review.
    err = float(np.max(np.abs(np.asarray(out) - np.asarray(ref))))
    assert np.allclose(np.asarray(out), np.asarray(ref), atol=2e-2, rtol=2e-2), (
        "mismatch vs reference: max abs err = %g" % err)

    print("KERNEL_OK")
</pallas_src>

<mosaic_0001>
module attributes {stable_mosaic.version = 11 : i64} {
  func.func @kernel(%arg0: memref<16x4xf32, #tpu.memory_space<vmem>>, %arg1: memref<4x256xf32, #tpu.memory_space<vmem>>, %arg2: memref<1x256xf32, #tpu.memory_space<vmem>>, %arg3: memref<64x256xbf16, #tpu.memory_space<vmem>>, %arg4: memref<64x128xf32, #tpu.memory_space<vmem>>, %arg5: memref<1x128xf32, #tpu.memory_space<vmem>>, %arg6: memref<1x64xf32, #tpu.memory_space<vmem>>, %arg7: memref<16x128xf32, #tpu.memory_space<vmem>>) attributes {dimension_semantics = [], scalar_prefetch = 0 : i64, scratch_operands = 0 : i64, tpu.core_type = #tpu.core_type<tc>} {
    %c0 = arith.constant 0 : index
    %c0_0 = arith.constant 0 : index
    %0 = vector.load %arg0[%c0, %c0_0] : memref<16x4xf32, #tpu.memory_space<vmem>>, vector<16x4xf32>
    %c0_1 = arith.constant 0 : index
    %c0_2 = arith.constant 0 : index
    %1 = vector.load %arg1[%c0_1, %c0_2] : memref<4x256xf32, #tpu.memory_space<vmem>>, vector<4x256xf32>
    %cst = arith.constant dense<0.000000e+00> : vector<16x256xf32>
    %2 = tpu.matmul %0, %1, %cst {dimension_numbers = #tpu.dot_dimension_numbers<[1], [0], [0], [1], [0, 0, 1, 1], [], []>} : vector<16x4xf32>, vector<4x256xf32>, vector<16x256xf32> -> vector<16x256xf32>
    %c0_3 = arith.constant 0 : index
    %c0_4 = arith.constant 0 : index
    %3 = vector.load %arg2[%c0_3, %c0_4] : memref<1x256xf32, #tpu.memory_space<vmem>>, vector<1x256xf32>
    %4 = vector.broadcast %3 : vector<1x256xf32> to vector<16x256xf32>
    %5 = arith.addf %2, %4 : vector<16x256xf32>
    %c0_5 = arith.constant 0 : index
    %c0_6 = arith.constant 0 : index
    %6 = vector.load %arg3[%c0_5, %c0_6] : memref<64x256xbf16, #tpu.memory_space<vmem>>, vector<64x256xbf16>
    %c0_7 = arith.constant 0 : index
    %c0_8 = arith.constant 0 : index
    %7 = vector.load %arg4[%c0_7, %c0_8] : memref<64x128xf32, #tpu.memory_space<vmem>>, vector<64x128xf32>
    %c0_9 = arith.constant 0 : index
    %c0_10 = arith.constant 0 : index
    %8 = vector.load %arg5[%c0_9, %c0_10] : memref<1x128xf32, #tpu.memory_space<vmem>>, vector<1x128xf32>
    %c0_11 = arith.constant 0 : index
    %c0_12 = arith.constant 0 : index
    %9 = vector.load %arg6[%c0_11, %c0_12] : memref<1x64xf32, #tpu.memory_space<vmem>>, vector<1x64xf32>
    %cst_13 = arith.constant 0.000000e+00 : f32
    %10 = vector.broadcast %cst_13 : f32 to vector<2x64xf32>
    %11 = vector.extract_strided_slice %5 {offsets = [0, 0], sizes = [2, 256], strides = [1, 1]} : vector<16x256xf32> to vector<2x256xf32>
    %12 = arith.negf %11 : vector<2x256xf32>
    %13 = math.exp %12 : vector<2x256xf32>
    %cst_14 = arith.constant 1.000000e+00 : f32
    %14 = vector.broadcast %cst_14 : f32 to vector<2x256xf32>
    %15 = arith.addf %14, %13 : vector<2x256xf32>
    %16 = arith.divf %14, %15 : vector<2x256xf32>
    %17 = math.tanh %11 : vector<2x256xf32>
    %18 = vector.extract_strided_slice %16 {offsets = [0, 64], sizes = [2, 64], strides = [1, 1]} : vector<2x256xf32> to vector<2x64xf32>
    %19 = arith.mulf %18, %10 : vector<2x64xf32>
    %20 = vector.extract_strided_slice %16 {offsets = [0, 0], sizes = [2, 64], strides = [1, 1]} : vector<2x256xf32> to vector<2x64xf32>
    %21 = vector.extract_strided_slice %17 {offsets = [0, 128], sizes = [2, 64], strides = [1, 1]} : vector<2x256xf32> to vector<2x64xf32>
    %22 = arith.mulf %20, %21 : vector<2x64xf32>
    %23 = arith.addf %19, %22 : vector<2x64xf32>
    %24 = vector.extract_strided_slice %16 {offsets = [0, 192], sizes = [2, 64], strides = [1, 1]} : vector<2x256xf32> to vector<2x64xf32>
    %25 = math.tanh %23 : vector<2x64xf32>
    %26 = arith.mulf %24, %25 : vector<2x64xf32>
    %27 = vector.broadcast %9 : vector<1x64xf32> to vector<2x64xf32>
    %28 = arith.mulf %23, %27 : vector<2x64xf32>
    %29 = vector.broadcast %9 : vector<1x64xf32> to vector<2x64xf32>
    %30 = arith.mulf %26, %29 : vector<2x64xf32>
    %31 = vector.extract_strided_slice %5 {offsets = [2, 0], sizes = [2, 256], strides = [1, 1]} : vector<16x256xf32> to vector<2x256xf32>
    %32 = arith.truncf %30 : vector<2x64xf32> to vector<2x64xbf16>
    %cst_15 = arith.constant dense<0.000000e+00> : vector<2x256xf32>
    %33 = tpu.matmul %32, %6, %cst_15 {dimension_numbers = #tpu.dot_dimension_numbers<[1], [0], [0], [1], [0, 0, 1, 1], [], []>} : vector<2x64xbf16>, vector<64x256xbf16>, vector<2x256xf32> -> vector<2x256xf32>
    %34 = arith.addf %31, %33 : vector<2x256xf32>
    %35 = arith.negf %34 : vector<2x256xf32>
    %36 = math.exp %35 : vector<2x256xf32>
    %cst_16 = arith.constant 1.000000e+00 : f32
    %37 = vector.broadcast %cst_16 : f32 to vector<2x256xf32>
    %38 = arith.addf %37, %36 : vector<2x256xf32>
    %39 = arith.divf %37, %38 : vector<2x256xf32>
    %40 = math.tanh %34 : vector<2x256xf32>
    %41 = vector.extract_strided_slice %39 {offsets = [0, 64], sizes = [2, 64], strides = [1, 1]} : vector<2x256xf32> to vector<2x64xf32>
    %42 = arith.mulf %41, %28 : vector<2x64xf32>
    %43 = vector.extract_strided_slice %39 {offsets = [0, 0], sizes = [2, 64], strides = [1, 1]} : vector<2x256xf32> to vector<2x64xf32>
    %44 = vector.extract_strided_slice %40 {offsets = [0, 128], sizes = [2, 64], strides = [1, 1]} : vector<2x256xf32> to vector<2x64xf32>
    %45 = arith.mulf %43, %44 : vector<2x64xf32>
    %46 = arith.addf %42, %45 : vector<2x64xf32>
    %47 = vector.extract_strided_slice %39 {offsets = [0, 192], sizes = [2, 64], strides = [1, 1]} : vector<2x256xf32> to vector<2x64xf32>
    %48 = math.tanh %46 : vector<2x64xf32>
    %49 = arith.mulf %47, %48 : vector<2x64xf32>
    %cst_17 = arith.constant dense<0.000000e+00> : vector<2x128xf32>
    %50 = tpu.matmul %49, %7, %cst_17 {dimension_numbers = #tpu.dot_dimension_numbers<[1], [0], [0], [1], [0, 0, 1, 1], [], []>} : vector<2x64xf32>, vector<64x128xf32>, vector<2x128xf32> -> vector<2x128xf32>
    %51 = vector.broadcast %8 : vector<1x128xf32> to vector<2x128xf32>
    %52 = arith.addf %50, %51 : vector<2x128xf32>
    %c0_18 = arith.constant 0 : index
    %c0_19 = arith.constant 0 : index
    %53 = vector.load %arg7[%c0_18, %c0_19] : memref<16x128xf32, #tpu.memory_space<vmem>>, vector<2x128xf32>
    tpu.vector_store %arg7[%c0_18, %c0_19], %52 {strides = array<i32>} : memref<16x128xf32, #tpu.memory_space<vmem>>, vector<2x128xf32>,
    %54 = vector.extract_strided_slice %5 {offsets = [4, 0], sizes = [2, 256], strides = [1, 1]} : vector<16x256xf32> to vector<2x256xf32>
    %55 = arith.truncf %49 : vector<2x64xf32> to vector<2x64xbf16>
    %cst_20 = arith.constant dense<0.000000e+00> : vector<2x256xf32>
    %56 = tpu.matmul %55, %6, %cst_20 {dimension_numbers = #tpu.dot_dimension_numbers<[1], [0], [0], [1], [0, 0, 1, 1], [], []>} : vector<2x64xbf16>, vector<64x256xbf16>, vector<2x256xf32> -> vector<2x256xf32>
    %57 = arith.addf %54, %56 : vector<2x256xf32>
    %58 = arith.negf %57 : vector<2x256xf32>
    %59 = math.exp %58 : vector<2x256xf32>
    %cst_21 = arith.constant 1.000000e+00 : f32
    %60 = vector.broadcast %cst_21 : f32 to vector<2x256xf32>
    %61 = arith.addf %60, %59 : vector<2x256xf32>
    %62 = arith.divf %60, %61 : vector<2x256xf32>
    %63 = math.tanh %57 : vector<2x256xf32>
    %64 = vector.extract_strided_slice %62 {offsets = [0, 64], sizes = [2, 64], strides = [1, 1]} : vector<2x256xf32> to vector<2x64xf32>
    %65 = arith.mulf %64, %46 : vector<2x64xf32>
    %66 = vector.extract_strided_slice %62 {offsets = [0, 0], sizes = [2, 64], strides = [1, 1]} : vector<2x256xf32> to vector<2x64xf32>
    %67 = vector.extract_strided_slice %63 {offsets = [0, 128], sizes = [2, 64], strides = [1, 1]} : vector<2x256xf32> to vector<2x64xf32>
    %68 = arith.mulf %66, %67 : vector<2x64xf32>
    %69 = arith.addf %65, %68 : vector<2x64xf32>
    %70 = vector.extract_strided_slice %62 {offsets = [0, 192], sizes = [2, 64], strides = [1, 1]} : vector<2x256xf32> to vector<2x64xf32>
    %71 = math.tanh %69 : vector<2x64xf32>
    %72 = arith.mulf %70, %71 : vector<2x64xf32>
    %cst_22 = arith.constant dense<0.000000e+00> : vector<2x128xf32>
    %73 = tpu.matmul %72, %7, %cst_22 {dimension_numbers = #tpu.dot_dimension_numbers<[1], [0], [0], [1], [0, 0, 1, 1], [], []>} : vector<2x64xf32>, vector<64x128xf32>, vector<2x128xf32> -> vector<2x128xf32>
    %74 = vector.broadcast %8 : vector<1x128xf32> to vector<2x128xf32>
    %75 = arith.addf %73, %74 : vector<2x128xf32>
    %c2 = arith.constant 2 : index
    %c0_23 = arith.constant 0 : index
    %76 = vector.load %arg7[%c2, %c0_23] : memref<16x128xf32, #tpu.memory_space<vmem>>, vector<2x128xf32>
    tpu.vector_store %arg7[%c2, %c0_23], %75 {strides = array<i32>} : memref<16x128xf32, #tpu.memory_space<vmem>>, vector<2x128xf32>,
    %77 = vector.extract_strided_slice %5 {offsets = [6, 0], sizes = [2, 256], strides = [1, 1]} : vector<16x256xf32> to vector<2x256xf32>
    %78 = arith.truncf %72 : vector<2x64xf32> to vector<2x64xbf16>
    %cst_24 = arith.constant dense<0.000000e+00> : vector<2x256xf32>
    %79 = tpu.matmul %78, %6, %cst_24 {dimension_numbers = #tpu.dot_dimension_numbers<[1], [0], [0], [1], [0, 0, 1, 1], [], []>} : vector<2x64xbf16>, vector<64x256xbf16>, vector<2x256xf32> -> vector<2x256xf32>
    %80 = arith.addf %77, %79 : vector<2x256xf32>
    %81 = arith.negf %80 : vector<2x256xf32>
    %82 = math.exp %81 : vector<2x256xf32>
    %cst_25 = arith.constant 1.000000e+00 : f32
    %83 = vector.broadcast %cst_25 : f32 to vector<2x256xf32>
    %84 = arith.addf %83, %82 : vector<2x256xf32>
    %85 = arith.divf %83, %84 : vector<2x256xf32>
    %86 = math.tanh %80 : vector<2x256xf32>
    %87 = vector.extract_strided_slice %85 {offsets = [0, 64], sizes = [2, 64], strides = [1, 1]} : vector<2x256xf32> to vector<2x64xf32>
    %88 = arith.mulf %87, %69 : vector<2x64xf32>
    %89 = vector.extract_strided_slice %85 {offsets = [0, 0], sizes = [2, 64], strides = [1, 1]} : vector<2x256xf32> to vector<2x64xf32>
    %90 = vector.extract_strided_slice %86 {offsets = [0, 128], sizes = [2, 64], strides = [1, 1]} : vector<2x256xf32> to vector<2x64xf32>
    %91 = arith.mulf %89, %90 : vector<2x64xf32>
    %92 = arith.addf %88, %91 : vector<2x64xf32>
    %93 = vector.extract_strided_slice %85 {offsets = [0, 192], sizes = [2, 64], strides = [1, 1]} : vector<2x256xf32> to vector<2x64xf32>
    %94 = math.tanh %92 : vector<2x64xf32>
    %95 = arith.mulf %93, %94 : vector<2x64xf32>
    %cst_26 = arith.constant dense<0.000000e+00> : vector<2x128xf32>
    %96 = tpu.matmul %95, %7, %cst_26 {dimension_numbers = #tpu.dot_dimension_numbers<[1], [0], [0], [1], [0, 0, 1, 1], [], []>} : vector<2x64xf32>, vector<64x128xf32>, vector<2x128xf32> -> vector<2x128xf32>
    %97 = vector.broadcast %8 : vector<1x128xf32> to vector<2x128xf32>
    %98 = arith.addf %96, %97 : vector<2x128xf32>
    %c4 = arith.constant 4 : index
    %c0_27 = arith.constant 0 : index
    %99 = vector.load %arg7[%c4, %c0_27] : memref<16x128xf32, #tpu.memory_space<vmem>>, vector<2x128xf32>
    tpu.vector_store %arg7[%c4, %c0_27], %98 {strides = array<i32>} : memref<16x128xf32, #tpu.memory_space<vmem>>, vector<2x128xf32>,
    %100 = vector.extract_strided_slice %5 {offsets = [8, 0], sizes = [2, 256], strides = [1, 1]} : vector<16x256xf32> to vector<2x256xf32>
    %101 = arith.truncf %95 : vector<2x64xf32> to vector<2x64xbf16>
    %cst_28 = arith.constant dense<0.000000e+00> : vector<2x256xf32>
    %102 = tpu.matmul %101, %6, %cst_28 {dimension_numbers = #tpu.dot_dimension_numbers<[1], [0], [0], [1], [0, 0, 1, 1], [], []>} : vector<2x64xbf16>, vector<64x256xbf16>, vector<2x256xf32> -> vector<2x256xf32>
    %103 = arith.addf %100, %102 : vector<2x256xf32>
    %104 = arith.negf %103 : vector<2x256xf32>
    %105 = math.exp %104 : vector<2x256xf32>
    %cst_29 = arith.constant 1.000000e+00 : f32
    %106 = vector.broadcast %cst_29 : f32 to vector<2x256xf32>
    %107 = arith.addf %106, %105 : vector<2x256xf32>
    %108 = arith.divf %106, %107 : vector<2x256xf32>
    %109 = math.tanh %103 : vector<2x256xf32>
    %110 = vector.extract_strided_slice %108 {offsets = [0, 64], sizes = [2, 64], strides = [1, 1]} : vector<2x256xf32> to vector<2x64xf32>
    %111 = arith.mulf %110, %92 : vector<2x64xf32>
    %112 = vector.extract_strided_slice %108 {offsets = [0, 0], sizes = [2, 64], strides = [1, 1]} : vector<2x256xf32> to vector<2x64xf32>
    %113 = vector.extract_strided_slice %109 {offsets = [0, 128], sizes = [2, 64], strides = [1, 1]} : vector<2x256xf32> to vector<2x64xf32>
    %114 = arith.mulf %112, %113 : vector<2x64xf32>
    %115 = arith.addf %111, %114 : vector<2x64xf32>
    %116 = vector.extract_strided_slice %108 {offsets = [0, 192], sizes = [2, 64], strides = [1, 1]} : vector<2x256xf32> to vector<2x64xf32>
    %117 = math.tanh %115 : vector<2x64xf32>
    %118 = arith.mulf %116, %117 : vector<2x64xf32>
    %cst_30 = arith.constant dense<0.000000e+00> : vector<2x128xf32>
    %119 = tpu.matmul %118, %7, %cst_30 {dimension_numbers = #tpu.dot_dimension_numbers<[1], [0], [0], [1], [0, 0, 1, 1], [], []>} : vector<2x64xf32>, vector<64x128xf32>, vector<2x128xf32> -> vector<2x128xf32>
    %120 = vector.broadcast %8 : vector<1x128xf32> to vector<2x128xf32>
    %121 = arith.addf %119, %120 : vector<2x128xf32>
    %c6 = arith.constant 6 : index
    %c0_31 = arith.constant 0 : index
    %122 = vector.load %arg7[%c6, %c0_31] : memref<16x128xf32, #tpu.memory_space<vmem>>, vector<2x128xf32>
    tpu.vector_store %arg7[%c6, %c0_31], %121 {strides = array<i32>} : memref<16x128xf32, #tpu.memory_space<vmem>>, vector<2x128xf32>,
    %123 = vector.extract_strided_slice %5 {offsets = [10, 0], sizes = [2, 256], strides = [1, 1]} : vector<16x256xf32> to vector<2x256xf32>
    %124 = arith.truncf %118 : vector<2x64xf32> to vector<2x64xbf16>
    %cst_32 = arith.constant dense<0.000000e+00> : vector<2x256xf32>
    %125 = tpu.matmul %124, %6, %cst_32 {dimension_numbers = #tpu.dot_dimension_numbers<[1], [0], [0], [1], [0, 0, 1, 1], [], []>} : vector<2x64xbf16>, vector<64x256xbf16>, vector<2x256xf32> -> vector<2x256xf32>
    %126 = arith.addf %123, %125 : vector<2x256xf32>
    %127 = arith.negf %126 : vector<2x256xf32>
    %128 = math.exp %127 : vector<2x256xf32>
    %cst_33 = arith.constant 1.000000e+00 : f32
    %129 = vector.broadcast %cst_33 : f32 to vector<2x256xf32>
    %130 = arith.addf %129, %128 : vector<2x256xf32>
    %131 = arith.divf %129, %130 : vector<2x256xf32>
    %132 = math.tanh %126 : vector<2x256xf32>
    %133 = vector.extract_strided_slice %131 {offsets = [0, 64], sizes = [2, 64], strides = [1, 1]} : vector<2x256xf32> to vector<2x64xf32>
    %134 = arith.mulf %133, %115 : vector<2x64xf32>
    %135 = vector.extract_strided_slice %131 {offsets = [0, 0], sizes = [2, 64], strides = [1, 1]} : vector<2x256xf32> to vector<2x64xf32>
    %136 = vector.extract_strided_slice %132 {offsets = [0, 128], sizes = [2, 64], strides = [1, 1]} : vector<2x256xf32> to vector<2x64xf32>
    %137 = arith.mulf %135, %136 : vector<2x64xf32>
    %138 = arith.addf %134, %137 : vector<2x64xf32>
    %139 = vector.extract_strided_slice %131 {offsets = [0, 192], sizes = [2, 64], strides = [1, 1]} : vector<2x256xf32> to vector<2x64xf32>
    %140 = math.tanh %138 : vector<2x64xf32>
    %141 = arith.mulf %139, %140 : vector<2x64xf32>
    %cst_34 = arith.constant dense<0.000000e+00> : vector<2x128xf32>
    %142 = tpu.matmul %141, %7, %cst_34 {dimension_numbers = #tpu.dot_dimension_numbers<[1], [0], [0], [1], [0, 0, 1, 1], [], []>} : vector<2x64xf32>, vector<64x128xf32>, vector<2x128xf32> -> vector<2x128xf32>
    %143 = vector.broadcast %8 : vector<1x128xf32> to vector<2x128xf32>
    %144 = arith.addf %142, %143 : vector<2x128xf32>
    %c8 = arith.constant 8 : index
    %c0_35 = arith.constant 0 : index
    %145 = vector.load %arg7[%c8, %c0_35] : memref<16x128xf32, #tpu.memory_space<vmem>>, vector<2x128xf32>
    tpu.vector_store %arg7[%c8, %c0_35], %144 {strides = array<i32>} : memref<16x128xf32, #tpu.memory_space<vmem>>, vector<2x128xf32>,
    %146 = vector.extract_strided_slice %5 {offsets = [12, 0], sizes = [2, 256], strides = [1, 1]} : vector<16x256xf32> to vector<2x256xf32>
    %147 = arith.truncf %141 : vector<2x64xf32> to vector<2x64xbf16>
    %cst_36 = arith.constant dense<0.000000e+00> : vector<2x256xf32>
    %148 = tpu.matmul %147, %6, %cst_36 {dimension_numbers = #tpu.dot_dimension_numbers<[1], [0], [0], [1], [0, 0, 1, 1], [], []>} : vector<2x64xbf16>, vector<64x256xbf16>, vector<2x256xf32> -> vector<2x256xf32>
    %149 = arith.addf %146, %148 : vector<2x256xf32>
    %150 = arith.negf %149 : vector<2x256xf32>
    %151 = math.exp %150 : vector<2x256xf32>
    %cst_37 = arith.constant 1.000000e+00 : f32
    %152 = vector.broadcast %cst_37 : f32 to vector<2x256xf32>
    %153 = arith.addf %152, %151 : vector<2x256xf32>
    %154 = arith.divf %152, %153 : vector<2x256xf32>
    %155 = math.tanh %149 : vector<2x256xf32>
    %156 = vector.extract_strided_slice %154 {offsets = [0, 64], sizes = [2, 64], strides = [1, 1]} : vector<2x256xf32> to vector<2x64xf32>
    %157 = arith.mulf %156, %138 : vector<2x64xf32>
    %158 = vector.extract_strided_slice %154 {offsets = [0, 0], sizes = [2, 64], strides = [1, 1]} : vector<2x256xf32> to vector<2x64xf32>
    %159 = vector.extract_strided_slice %155 {offsets = [0, 128], sizes = [2, 64], strides = [1, 1]} : vector<2x256xf32> to vector<2x64xf32>
    %160 = arith.mulf %158, %159 : vector<2x64xf32>
    %161 = arith.addf %157, %160 : vector<2x64xf32>
    %162 = vector.extract_strided_slice %154 {offsets = [0, 192], sizes = [2, 64], strides = [1, 1]} : vector<2x256xf32> to vector<2x64xf32>
    %163 = math.tanh %161 : vector<2x64xf32>
    %164 = arith.mulf %162, %163 : vector<2x64xf32>
    %cst_38 = arith.constant dense<0.000000e+00> : vector<2x128xf32>
    %165 = tpu.matmul %164, %7, %cst_38 {dimension_numbers = #tpu.dot_dimension_numbers<[1], [0], [0], [1], [0, 0, 1, 1], [], []>} : vector<2x64xf32>, vector<64x128xf32>, vector<2x128xf32> -> vector<2x128xf32>
    %166 = vector.broadcast %8 : vector<1x128xf32> to vector<2x128xf32>
    %167 = arith.addf %165, %166 : vector<2x128xf32>
    %c10 = arith.constant 10 : index
    %c0_39 = arith.constant 0 : index
    %168 = vector.load %arg7[%c10, %c0_39] : memref<16x128xf32, #tpu.memory_space<vmem>>, vector<2x128xf32>
    tpu.vector_store %arg7[%c10, %c0_39], %167 {strides = array<i32>} : memref<16x128xf32, #tpu.memory_space<vmem>>, vector<2x128xf32>,
    %169 = vector.extract_strided_slice %5 {offsets = [14, 0], sizes = [2, 256], strides = [1, 1]} : vector<16x256xf32> to vector<2x256xf32>
    %170 = arith.truncf %164 : vector<2x64xf32> to vector<2x64xbf16>
    %cst_40 = arith.constant dense<0.000000e+00> : vector<2x256xf32>
    %171 = tpu.matmul %170, %6, %cst_40 {dimension_numbers = #tpu.dot_dimension_numbers<[1], [0], [0], [1], [0, 0, 1, 1], [], []>} : vector<2x64xbf16>, vector<64x256xbf16>, vector<2x256xf32> -> vector<2x256xf32>
    %172 = arith.addf %169, %171 : vector<2x256xf32>
    %173 = arith.negf %172 : vector<2x256xf32>
    %174 = math.exp %173 : vector<2x256xf32>
    %cst_41 = arith.constant 1.000000e+00 : f32
    %175 = vector.broadcast %cst_41 : f32 to vector<2x256xf32>
    %176 = arith.addf %175, %174 : vector<2x256xf32>
    %177 = arith.divf %175, %176 : vector<2x256xf32>
    %178 = math.tanh %172 : vector<2x256xf32>
    %179 = vector.extract_strided_slice %177 {offsets = [0, 64], sizes = [2, 64], strides = [1, 1]} : vector<2x256xf32> to vector<2x64xf32>
    %180 = arith.mulf %179, %161 : vector<2x64xf32>
    %181 = vector.extract_strided_slice %177 {offsets = [0, 0], sizes = [2, 64], strides = [1, 1]} : vector<2x256xf32> to vector<2x64xf32>
    %182 = vector.extract_strided_slice %178 {offsets = [0, 128], sizes = [2, 64], strides = [1, 1]} : vector<2x256xf32> to vector<2x64xf32>
    %183 = arith.mulf %181, %182 : vector<2x64xf32>
    %184 = arith.addf %180, %183 : vector<2x64xf32>
    %185 = vector.extract_strided_slice %177 {offsets = [0, 192], sizes = [2, 64], strides = [1, 1]} : vector<2x256xf32> to vector<2x64xf32>
    %186 = math.tanh %184 : vector<2x64xf32>
    %187 = arith.mulf %185, %186 : vector<2x64xf32>
    %cst_42 = arith.constant dense<0.000000e+00> : vector<2x128xf32>
    %188 = tpu.matmul %187, %7, %cst_42 {dimension_numbers = #tpu.dot_dimension_numbers<[1], [0], [0], [1], [0, 0, 1, 1], [], []>} : vector<2x64xf32>, vector<64x128xf32>, vector<2x128xf32> -> vector<2x128xf32>
    %189 = vector.broadcast %8 : vector<1x128xf32> to vector<2x128xf32>
    %190 = arith.addf %188, %189 : vector<2x128xf32>
    %c12 = arith.constant 12 : index
    %c0_43 = arith.constant 0 : index
    %191 = vector.load %arg7[%c12, %c0_43] : memref<16x128xf32, #tpu.memory_space<vmem>>, vector<2x128xf32>
    tpu.vector_store %arg7[%c12, %c0_43], %190 {strides = array<i32>} : memref<16x128xf32, #tpu.memory_space<vmem>>, vector<2x128xf32>,
    %192 = vector.extract_strided_slice %5 {offsets = [14, 0], sizes = [2, 256], strides = [1, 1]} : vector<16x256xf32> to vector<2x256xf32>
    %193 = arith.truncf %187 : vector<2x64xf32> to vector<2x64xbf16>
    %cst_44 = arith.constant dense<0.000000e+00> : vector<2x256xf32>
    %194 = tpu.matmul %193, %6, %cst_44 {dimension_numbers = #tpu.dot_dimension_numbers<[1], [0], [0], [1], [0, 0, 1, 1], [], []>} : vector<2x64xbf16>, vector<64x256xbf16>, vector<2x256xf32> -> vector<2x256xf32>
    %195 = arith.addf %192, %194 : vector<2x256xf32>
    %196 = arith.negf %195 : vector<2x256xf32>
    %197 = math.exp %196 : vector<2x256xf32>
    %cst_45 = arith.constant 1.000000e+00 : f32
    %198 = vector.broadcast %cst_45 : f32 to vector<2x256xf32>
    %199 = arith.addf %198, %197 : vector<2x256xf32>
    %200 = arith.divf %198, %199 : vector<2x256xf32>
    %201 = math.tanh %195 : vector<2x256xf32>
    %202 = vector.extract_strided_slice %200 {offsets = [0, 64], sizes = [2, 64], strides = [1, 1]} : vector<2x256xf32> to vector<2x64xf32>
    %203 = arith.mulf %202, %184 : vector<2x64xf32>
    %204 = vector.extract_strided_slice %200 {offsets = [0, 0], sizes = [2, 64], strides = [1, 1]} : vector<2x256xf32> to vector<2x64xf32>
    %205 = vector.extract_strided_slice %201 {offsets = [0, 128], sizes = [2, 64], strides = [1, 1]} : vector<2x256xf32> to vector<2x64xf32>
    %206 = arith.mulf %204, %205 : vector<2x64xf32>
    %207 = arith.addf %203, %206 : vector<2x64xf32>
    %208 = vector.extract_strided_slice %200 {offsets = [0, 192], sizes = [2, 64], strides = [1, 1]} : vector<2x256xf32> to vector<2x64xf32>
    %209 = math.tanh %207 : vector<2x64xf32>
    %210 = arith.mulf %208, %209 : vector<2x64xf32>
    %cst_46 = arith.constant dense<0.000000e+00> : vector<2x128xf32>
    %211 = tpu.matmul %210, %7, %cst_46 {dimension_numbers = #tpu.dot_dimension_numbers<[1], [0], [0], [1], [0, 0, 1, 1], [], []>} : vector<2x64xf32>, vector<64x128xf32>, vector<2x128xf32> -> vector<2x128xf32>
    %212 = vector.broadcast %8 : vector<1x128xf32> to vector<2x128xf32>
    %213 = arith.addf %211, %212 : vector<2x128xf32>
    %c14 = arith.constant 14 : index
    %c0_47 = arith.constant 0 : index
    %214 = vector.load %arg7[%c14, %c0_47] : memref<16x128xf32, #tpu.memory_space<vmem>>, vector<2x128xf32>
    tpu.vector_store %arg7[%c14, %c0_47], %213 {strides = array<i32>} : memref<16x128xf32, #tpu.memory_space<vmem>>, vector<2x128xf32>,
    return
  }
}

</mosaic_0001>

<bundles_post_ra>
// kernel: lstm_forward.1
= control target key start
LH: loop header
LB: loop body
LE: loop exit
PB: predicated region body
PF: predicated region fallthrough
CT: control target
= control target key end

     0   :  { %12 = vsyncpa [#allocation3], 0  ;;  %s2447_s0 = inlined_call_operand.vmem [shape: f32[16,4], index: 0, kind: input, shape index: {}]   ;;  %s2448_s1 = inlined_call_operand.vmem [shape: f32[4,256], index: 1, kind: input, shape index: {}]   ;;  %s2449_s2 = inlined_call_operand.vmem [shape: f32[1,256], index: 2, kind: input, shape index: {}]   ;;  %s2450_s3 = inlined_call_operand.hbm [shape: bf16[64,256], index: 3, kind: input, shape index: {}]   ;;  %s2451_s4 = inlined_call_operand.hbm [shape: f32[64,128], index: 4, kind: input, shape index: {}]   ;;  %s2452_s5 = inlined_call_operand.vmem [shape: f32[1,128], index: 5, kind: input, shape index: {}]   ;;  %s2453_s6 = inlined_call_operand.vmem [shape: f32[1,64], index: 6, kind: input, shape index: {}]   ;;  %s2454_s7 = inlined_call_operand.vmem [shape: f32[16,128], index: 7, kind: output, shape index: {}]  }
   0x1   :  { %13 = vsyncpa [#allocation5], 0  ;;  %s1969_s24 = smov [#allocation2]  }
   0x2   :  { %s25_s25 = sshll.u32 %s1969_s24, 4  ;;  %s26_s25 = int_to_ptr.vmem [resolvable:$true] %s25_s25 }
   0x3   :  { %s1933_s26 = scalar_lea.vmem %s26_s25, 1024  ;;  %p1938_p1 = scmp.lt.s32.totalorder %s26_s25, %s26_s25 }
   0x4   :  { %p1934_p0 = scmp.ne.s32.totalorder %s26_s25, %s1933_s26  ;;  %p1939_p2 = scmp.lt.s32.totalorder %s1933_s26, %s1933_s26 }
   0x6   :  { %p1940_p3 = por %p1939_p2, %p1938_p1 }
   0x8   :  { %p1941_p4 = pnand %p1940_p3, %p1934_p0 }
   0xa   :  { %1944 = shalt.err (!%p1941_p4)
}
   0xb   :  { %s1970_s27 = smov 128   ;;  %s1971_s28 = smov 8  }
   0xc   :  { %31 = dma.hbm_to_vmem [thread:$0]  %s2450_s3, 1024, %s26_s25, [#allocation3], %s1970_s27, %s1970_s27, %s1971_s28  }
   0xd   :  { %s1972_s8 = smov [#allocation4]  }
   0xe   :  { %s37_s9 = sshll.u32 %s1972_s8, 4  ;;  %s38_s9 = int_to_ptr.vmem [resolvable:$true] %s37_s9 }
   0xf   :  { %s1953_s10 = scalar_lea.vmem %s38_s9, 1024  ;;  %p1958_p6 = scmp.lt.s32.totalorder %s38_s9, %s38_s9 }
  0x10   :  { %p1954_p5 = scmp.ne.s32.totalorder %s38_s9, %s1953_s10  ;;  %p1959_p7 = scmp.lt.s32.totalorder %s1953_s10, %s1953_s10 }
  0x12   :  { %p1960_p8 = por %p1959_p7, %p1958_p6 }
  0x14   :  { %p1961_p9 = pnand %p1960_p8, %p1954_p5 }
  0x16   :  { %1964 = shalt.err (!%p1961_p9)
}
  0x17   :  { %43 = dma.hbm_to_vmem [thread:$0]  %s2451_s4, 1024, %s38_s9, [#allocation5], %s1970_s27, %s1970_s27, %s1971_s28  }
  0x18   :  { %1965 = dma.done.wait [#allocation3], 1024  }
  0x19   :  { %1966 = vsyncadd [#allocation3], 4294966272 }
  0x1a   :  { %1967 = dma.done.wait [#allocation5], 1024  }
  0x1b   :  { %1968 = vsyncadd [#allocation5], 4294966272  ;;  %v1973_v0 = vmov 0.0   ;;  %v57_v1 = vld [vmem:[%s2448_s1] sm:$0xff]  ;;  %vm79_vm0 = vcmask 1043456   ;;  %vm72_vm1 = vcmask 31744   ;;  %v60_v4 = vlaneseq }
  0x1c   :  { %148 = vmatprep.mubr.f32.mxu0 %v1973_v0  ;;  %v55_v2 = vld [vmem:[%s2447_s0] sm:$0xff]  ;;  %v71_v3 = vcombine.high %v57_v1, %v57_v1  ;;  %v2053_v22 = vld [vmem:[#allocation2 + $0x34] ss:$8 sps:$4 sm:$0xff]   ;;  %v2055_v23 = vld [vmem:[#allocation2 + $0x30] ss:$8 sps:$4 sm:$0xff]   ;;  %v1975_v26 = vmov 0  }
  0x1d   :  { %v61_v5 = vshrl.u32 %v60_v4, 7  ;;  %v58_v7 = vld [vmem:[%s2449_s2] sm:$0x3]  ;;  %s1974_s2 = smov 64   ;;  %v2057_v24 = vld [vmem:[#allocation2 + $0x24] ss:$8 sps:$4 sm:$0xff]   ;;  %267 = vmatprep.subr.bf16.mxu1 %v2053_v22  ;;  %291 = vmatprep.mubr.bf16.mxu1 %v1975_v26 }
  0x1e   :  { %1524 = vmatprep.subr.msk.mxu0 %vm79_vm0, %v71_v3  ;;  %v1530_v21 = vld [vmem:[%s2453_s6] ss:$0 sm:$0xff]  ;;  %268 = vmatpush1.bf16.msra.mxu1 %v2055_v23  ;;  %v2065_v27 = vld [vmem:[#allocation2 + $0x14] ss:$8 sps:$4 sm:$0xff]   ;;  %v2068_v28 = vld [vmem:[#allocation2 + $0x10] ss:$8 sps:$4 sm:$0xff]  }
  0x1f   :  { %1525 = vmatpush1.msk.msra.mxu0 %vm79_vm0, %v57_v1  ;;  %v62_v6 = vsub.s32 0, %v61_v5  ;;  %v66_v12 = vsub.s32 1, %v61_v5  ;;  %v2061_v25 = vld [vmem:[#allocation2 + $0x20] ss:$8 sps:$4 sm:$0xff]   ;;  %269 = vmatprep.subr.bf16.mxu1 %v2057_v24  ;;  %v2071_v29 = vld [vmem:[#allocation2 + $0x4] ss:$8 sps:$4 sm:$0xff]  }
  0x20   :  { %1526 = vmatmul.mubr.msk.f32.vlgmr.msra.gmra.mxu0 %vm72_vm1, %v55_v2  ;;  %1644 = vmatprep.subr.mxu0 %v1973_v0  ;;  %v2074_v30 = vld [vmem:[#allocation2] ss:$8 sps:$4 sm:$0xff]   ;;  %vm255_vm2 = vcmask 523264   ;;  %vm1976_vm3 = vmmov 0  }
  0x21   :  { %154 = vmatprep.mubr.f32.mxu0 %v1973_v0  ;;  %v2036_v8 = vrot.slane %v58_v7, %v62_v6  ;;  %v2042_v13 = vrot.slane %v58_v7, %v66_v12 }
  0x22   :  { %270 = vmatpush1.bf16.msra.mxu1 %v2061_v25 }
  0x23   :  { %271 = vmatprep.subr.bf16.mxu1 %v2065_v27 }
  0x26   :  { %272 = vmatpush1.bf16.msra.mxu1 %v2068_v28 }
  0x27   :  { %273 = vmatprep.subr.bf16.mxu1 %v2071_v29 }
  0x2a   :  { %274 = vmatpush1.bf16.msra.mxu1 %v2074_v30 }
  0x2b   :  { %432 = vmatprep.subr.bf16.mxu1 %v2053_v22 }
  0xe0   :  { %v150_v9 = vpop.f32.mrf.mxu0 }
  0xe1   :  { %v2039_v10 = vadd.f32 %v150_v9, %v2036_v8 }
  0xe2   :  { %v152_v14 = vpop.f32.mrf.mxu0 }
  0xe3   :  { %v1528_v11 = vmul.f32 -1.442695, %v2039_v10  ;;  %v2045_v15 = vadd.f32 %v152_v14, %v2042_v13 }
  0xe5   :  { %1817 = vpow2.f32 %v1528_v11  ;;  %v1529_v31 = vmul.f32 -1.442695, %v2045_v15 }
  0xe6   :  { %1819 = vtanh.f32 %v2045_v15 }
  0xf2   :  { %v1818_v16 = vpop.eup %1817 }
  0xf3   :  { %v185_v17 = vadd.f32 1.0, %v1818_v16  ;;  %v1820_v18 = vpop.eup %1819 }
  0xf5   :  { %1821 = vrcp.f32 %v185_v17 }
  0xf6   :  { %1823 = vpow2.f32 %v1529_v31 }
 0x102   :  { %v1822_v19 = vpop.eup %1821 }
 0x103   :  { %v193_v20 = vmul.f32 %v1822_v19, %v1820_v18  ;;  %v1824_v32 = vpop.eup %1823  ;;  %v192_v34 = vmul.f32 0.0, %v1822_v19 }
 0x104   :  { %v186_v33 = vadd.f32 1.0, %v1824_v32 }
 0x105   :  { %195 = vrot.lane.b32.xlu0 %v193_v20, %s1974_s2 }
 0x106   :  { %1825 = vrcp.f32 %v186_v33 }
 0x109   :  { %206 = vrot.lane.b32.xlu0 %v1530_v21, %s1974_s2 }
 0x113   :  { %v1826_v37 = vpop.eup %1825 }
 0x177   :  { %v196_v35 = vpop.permute.xlu0 %195 }
 0x178   :  { %v198_v36 = vadd.f32 %v196_v35, %v192_v34 }
 0x17a   :  { %1827 = vtanh.f32 %v198_v36 }
 0x17b   :  { %v207_v40 = vpop.permute.xlu0 %206 }
 0x17c   :  { %v209_v55 = vmul.f32 %v207_v40, %v198_v36 }
 0x17e   :  { %v322_v57 = vrot.slane %v209_v55, 6 }
 0x187   :  { %v1828_v38 = vpop.eup %1827 }
 0x188   :  { %v200_v39 = vmul.f32 %v1828_v38, %v1826_v37 }
 0x18a   :  { %v210_v41 = vmul.f32 %v207_v40, %v200_v39 }
 0x18c   :  { %v211_v42 = vpack.c.bf16 %v210_v41, %v210_v41 }
 0x18e   :  { %213 = vrot.lane.b32.xlu1 %v211_v42, %s1974_s2 }
 0x200   :  { %v214_v43 = vpop.permute.xlu1 %213 }
 0x201   :  { %1539 = vmatmul.mubr.msk.bf16.vlgmr.msra.gmra.mxu1 %vm255_vm2, %v214_v43 }
 0x202   :  { %433 = vmatpush1.bf16.msra.mxu1 %v2055_v23  ;;  %456 = vmatprep.mubr.bf16.mxu1 %v1975_v26 }
 0x203   :  { %434 = vmatprep.subr.bf16.mxu1 %v2057_v24 }
 0x206   :  { %435 = vmatpush1.bf16.msra.mxu1 %v2061_v25 }
 0x207   :  { %436 = vmatprep.subr.bf16.mxu1 %v2065_v27 }
 0x20a   :  { %437 = vmatpush1.bf16.msra.mxu1 %v2068_v28 }
 0x20b   :  { %438 = vmatprep.subr.bf16.mxu1 %v2071_v29 }
 0x20e   :  { %439 = vmatpush1.bf16.msra.mxu1 %v2074_v30 }
 0x20f   :  { %591 = vmatprep.subr.bf16.mxu1 %v2053_v22 }
 0x2c1   :  { %v293_v44 = vpop.f32.mrf.mxu1 }
 0x2c2   :  { %v302_v45 = vrot.slane %v293_v44, 6 }
 0x2c3   :  { %v295_v46 = vpop.f32.mrf.mxu1 }
 0x2c4   :  { %v306_v47 = vadd.f32 %v302_v45, %v2039_v10  ;;  %v303_v51 = vrot.slane %v295_v46, 6 }
 0x2c5   :  { %v297_v48 = vpop.f32.mrf.mxu1 }
 0x2c6   :  { %v1540_v49 = vmul.f32 -1.442695, %v306_v47  ;;  %v307_v52 = vadd.f32 %v303_v51, %v2045_v15 }
 0x2c7   :  { %v298_v50 = vpop.f32.mrf.mxu1 }
 0x2c8   :  { %1829 = vpow2.f32 %v1540_v49  ;;  %v1541_v61 = vmul.f32 -1.442695, %v307_v52 }
 0x2c9   :  { %1831 = vtanh.f32 %v307_v52 }
 0x2d5   :  { %v1830_v53 = vpop.eup %1829 }
 0x2d6   :  { %v314_v54 = vadd.f32 1.0, %v1830_v53  ;;  %v1832_v56 = vpop.eup %1831 }
 0x2d8   :  { %1833 = vrcp.f32 %v314_v54 }
 0x2d9   :  { %1835 = vpow2.f32 %v1541_v61 }
 0x2e5   :  { %v1834_v58 = vpop.eup %1833 }
 0x2e6   :  { %v325_v59 = vmul.f32 %v1834_v58, %v1832_v56  ;;  %v324_v60 = vmul.f32 %v1834_v58, %v322_v57  ;;  %v1836_v62 = vpop.eup %1835 }
 0x2e7   :  { %v315_v63 = vadd.f32 1.0, %v1836_v62 }
 0x2e8   :  { %327 = vrot.lane.b32.xlu1 %v325_v59, %s1974_s2 }
 0x2e9   :  { %1837 = vrcp.f32 %v315_v63 }
 0x2f6   :  { %v1838_v3 = vpop.eup %1837 }
 0x35a   :  { %v328_v1 = vpop.permute.xlu1 %327 }
 0x35b   :  { %v330_v2 = vadd.f32 %v328_v1, %v324_v60 }
 0x35d   :  { %1839 = vtanh.f32 %v330_v2  ;;  %v487_v34 = vrot.slane %v330_v2, 6 }
 0x36a   :  { %v1840_v4 = vpop.eup %1839 }
 0x36b   :  { %v2094_v5 = vmul.f32 %v1840_v4, %v1838_v3 }
 0x36d   :  { %v416_v6 = vpack.c.bf16 %v2094_v5, %v2094_v5 }
 0x36f   :  { %v418_v7 = vrot.slane %v416_v6, 1 }
 0x371   :  { %419 = vrot.lane.b32.xlu0 %v418_v7, %s1974_s2 }
 0x3e3   :  { %v420_v9 = vpop.permute.xlu0 %419 }
 0x3e4   :  { %1544 = vmatmul.mubr.msk.bf16.vlgmr.msra.gmra.mxu1 %vm255_vm2, %v420_v9 }
 0x3e5   :  { %592 = vmatpush1.bf16.msra.mxu1 %v2055_v23  ;;  %615 = vmatprep.mubr.bf16.mxu1 %v1975_v26 }
 0x3e6   :  { %593 = vmatprep.subr.bf16.mxu1 %v2057_v24 }
 0x3e9   :  { %594 = vmatpush1.bf16.msra.mxu1 %v2061_v25 }
 0x3ea   :  { %595 = vmatprep.subr.bf16.mxu1 %v2065_v27 }
 0x3ed   :  { %596 = vmatpush1.bf16.msra.mxu1 %v2068_v28 }
 0x3ee   :  { %597 = vmatprep.subr.bf16.mxu1 %v2071_v29 }
 0x3f1   :  { %598 = vmatpush1.bf16.msra.mxu1 %v2074_v30 }
 0x3f2   :  { %750 = vmatprep.subr.bf16.mxu1 %v2053_v22 }
 0x4a4   :  { %v458_v11 = vpop.f32.mrf.mxu1 }
 0x4a5   :  { %v467_v12 = vrot.slane %v458_v11, 4 }
 0x4a6   :  { %v460_v14 = vpop.f32.mrf.mxu1 }
 0x4a7   :  { %v471_v16 = vadd.f32 %v467_v12, %v2039_v10  ;;  %v468_v20 = vrot.slane %v460_v14, 4 }
 0x4a8   :  { %v462_v17 = vpop.f32.mrf.mxu1 }
 0x4a9   :  { %v1545_v18 = vmul.f32 -1.442695, %v471_v16  ;;  %v472_v21 = vadd.f32 %v468_v20, %v2045_v15 }
 0x4aa   :  { %v463_v19 = vpop.f32.mrf.mxu1 }
 0x4ab   :  { %1841 = vpow2.f32 %v1545_v18  ;;  %v1546_v38 = vmul.f32 -1.442695, %v472_v21 }
 0x4ac   :  { %1843 = vtanh.f32 %v472_v21 }
 0x4b8   :  { %v1842_v31 = vpop.eup %1841 }
 0x4b9   :  { %v479_v32 = vadd.f32 1.0, %v1842_v31  ;;  %v1844_v33 = vpop.eup %1843 }
 0x4bb   :  { %1845 = vrcp.f32 %v479_v32 }
 0x4bc   :  { %1847 = vpow2.f32 %v1546_v38 }
 0x4c8   :  { %v1846_v35 = vpop.eup %1845 }
 0x4c9   :  { %v490_v36 = vmul.f32 %v1846_v35, %v1844_v33  ;;  %v489_v37 = vmul.f32 %v1846_v35, %v487_v34  ;;  %v1848_v39 = vpop.eup %1847 }
 0x4ca   :  { %v480_v40 = vadd.f32 1.0, %v1848_v39 }
 0x4cb   :  { %492 = vrot.lane.b32.xlu1 %v490_v36, %s1974_s2 }
 0x4cc   :  { %1849 = vrcp.f32 %v480_v40 }
 0x4d9   :  { %v1850_v43 = vpop.eup %1849 }
 0x53d   :  { %v493_v41 = vpop.permute.xlu1 %492 }
 0x53e   :  { %v495_v42 = vadd.f32 %v493_v41, %v489_v37 }
 0x540   :  { %1851 = vtanh.f32 %v495_v42  ;;  %v646_v61 = vrot.slane %v495_v42, 6 }
 0x54d   :  { %v1852_v44 = vpop.eup %1851 }
 0x54e   :  { %v2112_v45 = vmul.f32 %v1852_v44, %v1850_v43 }
 0x550   :  { %v575_v46 = vpack.c.bf16 %v2112_v45, %v2112_v45 }
 0x552   :  { %v577_v47 = vrot.slane %v575_v46, 2 }
 0x554   :  { %578 = vrot.lane.b32.xlu0 %v577_v47, %s1974_s2 }
 0x5c6   :  { %v579_v48 = vpop.permute.xlu0 %578 }
 0x5c7   :  { %1548 = vmatmul.mubr.msk.bf16.vlgmr.msra.gmra.mxu1 %vm255_vm2, %v579_v48 }
 0x5c8   :  { %751 = vmatpush1.bf16.msra.mxu1 %v2055_v23  ;;  %774 = vmatprep.mubr.bf16.mxu1 %v1975_v26 }
 0x5c9   :  { %752 = vmatprep.subr.bf16.mxu1 %v2057_v24 }
 0x5cc   :  { %753 = vmatpush1.bf16.msra.mxu1 %v2061_v25 }
 0x5cd   :  { %754 = vmatprep.subr.bf16.mxu1 %v2065_v27 }
 0x5d0   :  { %755 = vmatpush1.bf16.msra.mxu1 %v2068_v28 }
 0x5d1   :  { %756 = vmatprep.subr.bf16.mxu1 %v2071_v29 }
 0x5d4   :  { %757 = vmatpush1.bf16.msra.mxu1 %v2074_v30 }
 0x5d5   :  { %901 = vmatprep.subr.bf16.mxu1 %v2053_v22 }
 0x687   :  { %v617_v49 = vpop.f32.mrf.mxu1 }
 0x688   :  { %v626_v50 = vrot.slane %v617_v49, 2 }
 0x689   :  { %v619_v51 = vpop.f32.mrf.mxu1 }
 0x68a   :  { %v630_v52 = vadd.f32 %v626_v50, %v2039_v10  ;;  %v627_v56 = vrot.slane %v619_v51, 2  ;;  %v56_v10 = vld [vmem:[%s2447_s0 + $0x8] sm:$0xff] }
 0x68b   :  { %v621_v53 = vpop.f32.mrf.mxu1  ;;  %1527 = vmatmul.mubr.msk.f32.gmra.mxu0 %vm72_vm1, %v56_v10 }
 0x68c   :  { %v1549_v54 = vmul.f32 -1.442695, %v630_v52  ;;  %v631_v57 = vadd.f32 %v627_v56, %v2045_v15  ;;  %1660 = vmatprep.mubr.msk.f32.mxu0 %vm1976_vm3, %v1973_v0 }
 0x68d   :  { %v622_v55 = vpop.f32.mrf.mxu1 }
 0x68e   :  { %1853 = vpow2.f32 %v1549_v54  ;;  %v1550_v2 = vmul.f32 -1.442695, %v631_v57 }
 0x68f   :  { %1855 = vtanh.f32 %v631_v57 }
 0x69b   :  { %v1854_v58 = vpop.eup %1853 }
 0x69c   :  { %v638_v59 = vadd.f32 1.0, %v1854_v58  ;;  %v1856_v60 = vpop.eup %1855 }
 0x69e   :  { %1857 = vrcp.f32 %v638_v59 }
 0x69f   :  { %1859 = vpow2.f32 %v1550_v2 }
 0x6ab   :  { %v1858_v62 = vpop.eup %1857 }
 0x6ac   :  { %v649_v63 = vmul.f32 %v1858_v62, %v1856_v60  ;;  %v648_v1 = vmul.f32 %v1858_v62, %v646_v61  ;;  %v1860_v15 = vpop.eup %1859 }
 0x6ad   :  { %v639_v3 = vadd.f32 1.0, %v1860_v15 }
 0x6ae   :  { %651 = vrot.lane.b32.xlu1 %v649_v63, %s1974_s2 }
 0x6af   :  { %1861 = vrcp.f32 %v639_v3 }
 0x6bc   :  { %v1862_v7 = vpop.eup %1861 }
 0x720   :  { %v652_v4 = vpop.permute.xlu1 %651 }
 0x721   :  { %v654_v6 = vadd.f32 %v652_v4, %v648_v1 }
 0x723   :  { %1863 = vtanh.f32 %v654_v6  ;;  %v799_v39 = vrot.slane %v654_v6, 6 }
 0x730   :  { %v1864_v9 = vpop.eup %1863 }
 0x731   :  { %v2134_v11 = vmul.f32 %v1864_v9, %v1862_v7 }
 0x733   :  { %v734_v12 = vpack.c.bf16 %v2134_v11, %v2134_v11 }
 0x735   :  { %v736_v14 = vrot.slane %v734_v12, 3 }
 0x737   :  { %737 = vrot.lane.b32.xlu0 %v736_v14, %s1974_s2 }
 0x74b   :  { %v156_v17 = vpop.f32.mrf.mxu0 }
 0x74c   :  { %v2150_v18 = vadd.f32 %v156_v17, %v2036_v8 }
 0x74d   :  { %v158_v34 = vpop.f32.mrf.mxu0 }
 0x74e   :  { %v2154_v35 = vadd.f32 %v158_v34, %v2042_v13 }
 0x7a9   :  { %v738_v16 = vpop.permute.xlu0 %737 }
 0x7aa   :  { %1552 = vmatmul.mubr.msk.bf16.vlgmr.msra.gmra.mxu1 %vm255_vm2, %v738_v16 }
 0x7ab   :  { %902 = vmatpush1.bf16.msra.mxu1 %v2055_v23  ;;  %925 = vmatprep.mubr.bf16.mxu1 %v1975_v26 }
 0x7ac   :  { %903 = vmatprep.subr.bf16.mxu1 %v2057_v24 }
 0x7af   :  { %904 = vmatpush1.bf16.msra.mxu1 %v2061_v25 }
 0x7b0   :  { %905 = vmatprep.subr.bf16.mxu1 %v2065_v27 }
 0x7b3   :  { %906 = vmatpush1.bf16.msra.mxu1 %v2068_v28 }
 0x7b4   :  { %907 = vmatprep.subr.bf16.mxu1 %v2071_v29 }
 0x7b7   :  { %908 = vmatpush1.bf16.msra.mxu1 %v2074_v30 }
 0x7b8   :  { %1060 = vmatprep.subr.bf16.mxu1 %v2053_v22 }
 0x86a   :  { %v776_v19 = vpop.f32.mrf.mxu1 }
 0x86b   :  { %v783_v20 = vadd.f32 %v776_v19, %v2150_v18 }
 0x86c   :  { %v778_v21 = vpop.f32.mrf.mxu1 }
 0x86d   :  { %v1553_v31 = vmul.f32 -1.442695, %v783_v20  ;;  %v784_v36 = vadd.f32 %v778_v21, %v2154_v35 }
 0x86e   :  { %v780_v32 = vpop.f32.mrf.mxu1 }
 0x86f   :  { %1865 = vpow2.f32 %v1553_v31  ;;  %v1554_v43 = vmul.f32 -1.442695, %v784_v36 }
 0x870   :  { %v781_v33 = vpop.f32.mrf.mxu1  ;;  %1867 = vtanh.f32 %v784_v36 }
 0x87c   :  { %v1866_v37 = vpop.eup %1865 }
 0x87d   :  { %v791_v38 = vadd.f32 1.0, %v1866_v37  ;;  %v1868_v8 = vpop.eup %1867 }
 0x87f   :  { %1869 = vrcp.f32 %v791_v38 }
 0x880   :  { %1871 = vpow2.f32 %v1554_v43 }
 0x88c   :  { %v1870_v40 = vpop.eup %1869 }
 0x88d   :  { %v802_v41 = vmul.f32 %v1870_v40, %v1868_v8  ;;  %v801_v42 = vmul.f32 %v1870_v40, %v799_v39  ;;  %v1872_v44 = vpop.eup %1871 }
 0x88e   :  { %v792_v46 = vadd.f32 1.0, %v1872_v44 }
 0x88f   :  { %804 = vrot.lane.b32.xlu1 %v802_v41, %s1974_s2 }
 0x890   :  { %1873 = vrcp.f32 %v792_v46 }
 0x89d   :  { %v1874_v48 = vpop.eup %1873 }
 0x901   :  { %v805_v47 = vpop.permute.xlu1 %804 }
 0x902   :  { %v807_v13 = vadd.f32 %v805_v47, %v801_v42 }
 0x904   :  { %1875 = vtanh.f32 %v807_v13  ;;  %v956_v10 = vrot.slane %v807_v13, 6 }
 0x911   :  { %v1876_v49 = vpop.eup %1875 }
 0x912   :  { %v2158_v50 = vmul.f32 %v1876_v49, %v1874_v48 }
 0x914   :  { %v886_v51 = vpack.c.bf16 %v2158_v50, %v2158_v50 }
 0x916   :  { %888 = vrot.lane.b32.xlu0 %v886_v51, %s1974_s2 }
 0x988   :  { %v889_v52 = vpop.permute.xlu0 %888 }
 0x989   :  { %1556 = vmatmul.mubr.msk.bf16.vlgmr.msra.gmra.mxu1 %vm255_vm2, %v889_v52 }
 0x98a   :  { %1061 = vmatpush1.bf16.msra.mxu1 %v2055_v23  ;;  %1084 = vmatprep.mubr.bf16.mxu1 %v1975_v26 }
 0x98b   :  { %1062 = vmatprep.subr.bf16.mxu1 %v2057_v24 }
 0x98e   :  { %1063 = vmatpush1.bf16.msra.mxu1 %v2061_v25 }
 0x98f   :  { %1064 = vmatprep.subr.bf16.mxu1 %v2065_v27 }
 0x992   :  { %1065 = vmatpush1.bf16.msra.mxu1 %v2068_v28 }
 0x993   :  { %1066 = vmatprep.subr.bf16.mxu1 %v2071_v29 }
 0x996   :  { %1067 = vmatpush1.bf16.msra.mxu1 %v2074_v30 }
 0x997   :  { %1219 = vmatprep.subr.bf16.mxu1 %v2053_v22 }
 0xa49   :  { %v927_v53 = vpop.f32.mrf.mxu1 }
 0xa4a   :  { %v936_v54 = vrot.slane %v927_v53, 6 }
 0xa4b   :  { %v929_v55 = vpop.f32.mrf.mxu1 }
 0xa4c   :  { %v940_v56 = vadd.f32 %v936_v54, %v2150_v18  ;;  %v937_v60 = vrot.slane %v929_v55, 6 }
 0xa4d   :  { %v931_v57 = vpop.f32.mrf.mxu1 }
 0xa4e   :  { %v1557_v58 = vmul.f32 -1.442695, %v940_v56  ;;  %v941_v61 = vadd.f32 %v937_v60, %v2154_v35 }
 0xa4f   :  { %v932_v59 = vpop.f32.mrf.mxu1 }
 0xa50   :  { %1877 = vpow2.f32 %v1557_v58  ;;  %v1558_v4 = vmul.f32 -1.442695, %v941_v61  ;;  %v2211_v58 = vld [vmem:[#allocation4 + $0x38] sm:$0xff]  ;;  %v2213_v59 = vld [vmem:[#allocation4 + $0x30] sm:$0xff] }
 0xa51   :  { %1879 = vtanh.f32 %v941_v61  ;;  %1645 = vmatpush3.msra.mxu0 %v2211_v58 }
 0xa52   :  { %1646 = vmatprep.subr.mxu0 %v1973_v0 }
 0xa53   :  { %1647 = vmatpush3.msra.mxu0 %v2213_v59 }
 0xa54   :  { %1648 = vmatprep.subr.mxu0 %v1973_v0 }
 0xa5d   :  { %v1878_v62 = vpop.eup %1877 }
 0xa5e   :  { %v948_v63 = vadd.f32 1.0, %v1878_v62  ;;  %v1880_v1 = vpop.eup %1879 }
 0xa60   :  { %1881 = vrcp.f32 %v948_v63 }
 0xa61   :  { %1883 = vpow2.f32 %v1558_v4 }
 0xa6d   :  { %v1882_v2 = vpop.eup %1881 }
 0xa6e   :  { %v959_v15 = vmul.f32 %v1882_v2, %v1880_v1  ;;  %v958_v3 = vmul.f32 %v1882_v2, %v956_v10  ;;  %v1884_v6 = vpop.eup %1883 }
 0xa6f   :  { %v949_v7 = vadd.f32 1.0, %v1884_v6 }
 0xa70   :  { %961 = vrot.lane.b32.xlu1 %v959_v15, %s1974_s2  ;;  %v2237_v15 = vld [vmem:[#allocation4 + $0x8] sm:$0xff] }
 0xa71   :  { %1885 = vrcp.f32 %v949_v7 }
 0xa7e   :  { %v1886_v14 = vpop.eup %1885 }
 0xae2   :  { %v962_v9 = vpop.permute.xlu1 %961 }
 0xae3   :  { %v964_v12 = vadd.f32 %v962_v9, %v958_v3  ;;  %v2240_v3 = vld [vmem:[#allocation4] sm:$0xff] }
 0xae5   :  { %1887 = vtanh.f32 %v964_v12  ;;  %v1115_v43 = vrot.slane %v964_v12, 6 }
 0xaf2   :  { %v1888_v16 = vpop.eup %1887 }
 0xaf3   :  { %v2176_v17 = vmul.f32 %v1888_v16, %v1886_v14  ;;  %v340_v14 = vrot.slane %v2094_v5, 2  ;;  %v658_v16 = vrot.slane %v2134_v11, 6 }
 0xaf5   :  { %v1044_v19 = vpack.c.bf16 %v2176_v17, %v2176_v17 }
 0xaf7   :  { %v1046_v20 = vrot.slane %v1044_v19, 1 }
 0xaf9   :  { %1047 = vrot.lane.b32.xlu0 %v1046_v20, %s1974_s2 }
 0xb6b   :  { %v1048_v21 = vpop.permute.xlu0 %1047 }
 0xb6c   :  { %1560 = vmatmul.mubr.msk.bf16.vlgmr.msra.gmra.mxu1 %vm255_vm2, %v1048_v21 }
 0xb6d   :  { %1220 = vmatpush1.bf16.msra.mxu1 %v2055_v23  ;;  %1243 = vmatprep.mubr.bf16.mxu1 %v1975_v26 }
 0xb6e   :  { %1221 = vmatprep.subr.bf16.mxu1 %v2057_v24 }
 0xb71   :  { %1222 = vmatpush1.bf16.msra.mxu1 %v2061_v25 }
 0xb72   :  { %1223 = vmatprep.subr.bf16.mxu1 %v2065_v27 }
 0xb75   :  { %1224 = vmatpush1.bf16.msra.mxu1 %v2068_v28 }
 0xb76   :  { %1225 = vmatprep.subr.bf16.mxu1 %v2071_v29 }
 0xb79   :  { %1226 = vmatpush1.bf16.msra.mxu1 %v2074_v30 }
 0xb7a   :  { %1378 = vmatprep.subr.bf16.mxu1 %v2053_v22 }
 0xc2c   :  { %v1086_v31 = vpop.f32.mrf.mxu1 }
 0xc2d   :  { %v1095_v32 = vrot.slane %v1086_v31, 4 }
 0xc2e   :  { %v1088_v33 = vpop.f32.mrf.mxu1 }
 0xc2f   :  { %v1099_v34 = vadd.f32 %v1095_v32, %v2150_v18  ;;  %v1096_v8 = vrot.slane %v1088_v33, 4 }
 0xc30   :  { %v1090_v36 = vpop.f32.mrf.mxu1 }
 0xc31   :  { %v1561_v37 = vmul.f32 -1.442695, %v1099_v34  ;;  %v1100_v39 = vadd.f32 %v1096_v8, %v2154_v35 }
 0xc32   :  { %v1091_v38 = vpop.f32.mrf.mxu1 }
 0xc33   :  { %1889 = vpow2.f32 %v1561_v37  ;;  %v1562_v47 = vmul.f32 -1.442695, %v1100_v39  ;;  %v499_v38 = vrot.slane %v2112_v45, 4 }
 0xc34   :  { %1891 = vtanh.f32 %v1100_v39 }
 0xc40   :  { %v1890_v40 = vpop.eup %1889 }
 0xc41   :  { %v1107_v41 = vadd.f32 1.0, %v1890_v40  ;;  %v1892_v42 = vpop.eup %1891 }
 0xc43   :  { %1893 = vrcp.f32 %v1107_v41  ;;  %v2347_v41 = vld [vmem:[%s2452_s5] ss:$0 sm:$0xff] }
 0xc44   :  { %1895 = vpow2.f32 %v1562_v47 }
 0xc50   :  { %v1894_v44 = vpop.eup %1893 }
 0xc51   :  { %v1118_v22 = vmul.f32 %v1894_v44, %v1892_v42  ;;  %v1117_v46 = vmul.f32 %v1894_v44, %v1115_v43  ;;  %v1896_v13 = vpop.eup %1895 }
 0xc52   :  { %v1108_v48 = vadd.f32 1.0, %v1896_v13 }
 0xc53   :  { %1120 = vrot.lane.b32.xlu1 %v1118_v22, %s1974_s2 }
 0xc54   :  { %1897 = vrcp.f32 %v1108_v48 }
 0xc61   :  { %v1898_v52 = vpop.eup %1897 }
 0xcc5   :  { %v1121_v49 = vpop.permute.xlu1 %1120 }
 0xcc6   :  { %v2194_v51 = vadd.f32 %v1121_v49, %v1117_v46 }
 0xcc8   :  { %1899 = vtanh.f32 %v2194_v51  ;;  %v1274_v6 = vrot.slane %v2194_v51, 6 }
 0xcd5   :  { %v1900_v53 = vpop.eup %1899 }
 0xcd6   :  { %v2197_v54 = vmul.f32 %v1900_v53, %v1898_v52 }
 0xcd8   :  { %v1203_v55 = vpack.c.bf16 %v2197_v54, %v2197_v54  ;;  %v1127_v19 = vrot.slane %v2197_v54, 4 }
 0xcda   :  { %v1205_v56 = vrot.slane %v1203_v55, 2 }
 0xcdc   :  { %1206 = vrot.lane.b32.xlu0 %v1205_v56, %s1974_s2 }
 0xd4e   :  { %v1207_v57 = vpop.permute.xlu0 %1206 }
 0xd4f   :  { %1564 = vmatmul.mubr.msk.bf16.vlgmr.msra.gmra.mxu1 %vm255_vm2, %v1207_v57 }
 0xd50   :  { %1379 = vmatpush1.bf16.msra.mxu1 %v2055_v23  ;;  %1402 = vmatprep.mubr.bf16.mxu1 %v1975_v26  ;;  %v2217_v23 = vld [vmem:[#allocation4 + $0x28] sm:$0xff]  ;;  %v2229_v26 = vld [vmem:[#allocation4 + $0x10] sm:$0xff] }
 0xd51   :  { %1380 = vmatprep.subr.bf16.mxu1 %v2057_v24  ;;  %v2221_v24 = vld [vmem:[#allocation4 + $0x20] sm:$0xff]  ;;  %1649 = vmatpush3.msra.mxu0 %v2217_v23 }
 0xd52   :  { %1650 = vmatprep.subr.mxu0 %v1973_v0 }
 0xd53   :  { %1651 = vmatpush3.msra.mxu0 %v2221_v24 }
 0xd54   :  { %1381 = vmatpush1.bf16.msra.mxu1 %v2061_v25  ;;  %v2225_v25 = vld [vmem:[#allocation4 + $0x18] sm:$0xff]  ;;  %1652 = vmatprep.subr.mxu0 %v1973_v0 }
 0xd55   :  { %1382 = vmatprep.subr.bf16.mxu1 %v2065_v27  ;;  %1653 = vmatpush3.msra.mxu0 %v2225_v25 }
 0xd56   :  { %1654 = vmatprep.subr.mxu0 %v1973_v0 }
 0xd57   :  { %1655 = vmatpush3.msra.mxu0 %v2229_v26 }
 0xd58   :  { %1383 = vmatpush1.bf16.msra.mxu1 %v2068_v28  ;;  %1656 = vmatprep.subr.mxu0 %v1973_v0 }
 0xd59   :  { %1384 = vmatprep.subr.bf16.mxu1 %v2071_v29  ;;  %1657 = vmatpush3.msra.mxu0 %v2237_v15 }
 0xd5a   :  { %1658 = vmatprep.subr.mxu0 %v1973_v0 }
 0xd5b   :  { %1659 = vmatpush3.msra.mxu0 %v2240_v3 }
 0xd5c   :  { %1385 = vmatpush1.bf16.msra.mxu1 %v2074_v30  ;;  %1663 = vmatprep.subr.mxu0 %v1973_v0 }
 0xe0f   :  { %v1245_v27 = vpop.f32.mrf.mxu1 }
 0xe10   :  { %v1254_v28 = vrot.slane %v1245_v27, 2 }
 0xe11   :  { %v1247_v29 = vpop.f32.mrf.mxu1 }
 0xe12   :  { %v1258_v30 = vadd.f32 %v1254_v28, %v2150_v18  ;;  %v1255_v63 = vrot.slane %v1247_v29, 2 }
 0xe13   :  { %v1249_v60 = vpop.f32.mrf.mxu1 }
 0xe14   :  { %v1565_v61 = vmul.f32 -1.442695, %v1258_v30  ;;  %v1259_v1 = vadd.f32 %v1255_v63, %v2154_v35 }
 0xe15   :  { %v1250_v62 = vpop.f32.mrf.mxu1 }
 0xe16   :  { %1901 = vpow2.f32 %v1565_v61  ;;  %v1566_v20 = vmul.f32 -1.442695, %v1259_v1 }
 0xe17   :  { %1903 = vtanh.f32 %v1259_v1 }
 0xe23   :  { %v1902_v10 = vpop.eup %1901 }
 0xe24   :  { %v1266_v2 = vadd.f32 1.0, %v1902_v10  ;;  %v1904_v4 = vpop.eup %1903 }
 0xe26   :  { %1905 = vrcp.f32 %v1266_v2 }
 0xe27   :  { %1907 = vpow2.f32 %v1566_v20 }
 0xe33   :  { %v1906_v7 = vpop.eup %1905 }
 0xe34   :  { %v1277_v9 = vmul.f32 %v1906_v7, %v1904_v4  ;;  %v1276_v12 = vmul.f32 %v1906_v7, %v1274_v6  ;;  %v1908_v21 = vpop.eup %1907 }
 0xe35   :  { %v1267_v31 = vadd.f32 1.0, %v1908_v21 }
 0xe36   :  { %1279 = vrot.lane.b32.xlu1 %v1277_v9, %s1974_s2 }
 0xe37   :  { %1909 = vrcp.f32 %v1267_v31 }
 0xe3a   :  { %341 = vrot.lane.b32.xlu1 %v340_v14, %s1974_s2 }
 0xe3e   :  { %659 = vrot.lane.b32.xlu1 %v658_v16, %s1974_s2 }
 0xe42   :  { %811 = vrot.lane.b32.xlu1 %v2158_v50, %s1974_s2 }
 0xe44   :  { %v1910_v11 = vpop.eup %1909 }
 0xe46   :  { %1128 = vrot.lane.b32.xlu1 %v1127_v19, %s1974_s2 }
 0xea8   :  { %v1280_v32 = vpop.permute.xlu1 %1279 }
 0xea9   :  { %v2257_v33 = vadd.f32 %v1280_v32, %v1276_v12 }
 0xeab   :  { %1911 = vtanh.f32 %v2257_v33 }
 0xeac   :  { %v342_v5 = vpop.permute.xlu1 %341 }
 0xead   :  { %1661 = vmatmul.mubr.msk.f32.vlgmr.msra.gmra.mxu0 %vm255_vm2, %v342_v5 }
 0xeae   :  { %1664 = vmatpush3.msra.mxu0 %v2211_v58  ;;  %1679 = vmatprep.mubr.msk.f32.mxu0 %vm1976_vm3, %v1973_v0 }
 0xeaf   :  { %1665 = vmatprep.subr.mxu0 %v1973_v0 }
 0xeb0   :  { %1666 = vmatpush3.msra.mxu0 %v2213_v59  ;;  %v660_v45 = vpop.permute.xlu1 %659 }
 0xeb1   :  { %1667 = vmatprep.subr.mxu0 %v1973_v0 }
 0xeb2   :  { %1668 = vmatpush3.msra.mxu0 %v2217_v23 }
 0xeb3   :  { %1669 = vmatprep.subr.mxu0 %v1973_v0 }
 0xeb4   :  { %1670 = vmatpush3.msra.mxu0 %v2221_v24  ;;  %v812_v40 = vpop.permute.xlu1 %811 }
 0xeb5   :  { %1671 = vmatprep.subr.mxu0 %v1973_v0 }
 0xeb6   :  { %1672 = vmatpush3.msra.mxu0 %v2225_v25 }
 0xeb7   :  { %1673 = vmatprep.subr.mxu0 %v1973_v0 }
 0xeb8   :  { %v1912_v50 = vpop.eup %1911  ;;  %1674 = vmatpush3.msra.mxu0 %v2229_v26  ;;  %v1129_v21 = vpop.permute.xlu1 %1128 }
 0xeb9   :  { %v2274_v34 = vmul.f32 %v1912_v50, %v1910_v11  ;;  %1675 = vmatprep.subr.mxu0 %v1973_v0 }
 0xeba   :  { %1676 = vmatpush3.msra.mxu0 %v2237_v15 }
 0xebb   :  { %v1362_v36 = vpack.c.bf16 %v2274_v34, %v2274_v34  ;;  %1677 = vmatprep.subr.mxu0 %v1973_v0  ;;  %v1286_v10 = vrot.slane %v2274_v34, 6 }
 0xebc   :  { %1678 = vmatpush3.msra.mxu0 %v2240_v3 }
 0xebd   :  { %v1364_v37 = vrot.slane %v1362_v36, 3  ;;  %1682 = vmatprep.subr.mxu0 %v1973_v0 }
 0xebf   :  { %1365 = vrot.lane.b32.xlu0 %v1364_v37, %s1974_s2 }
 0xec3   :  { %500 = vrot.lane.b32.xlu0 %v499_v38, %s1974_s2 }
 0xf31   :  { %v1366_v8 = vpop.permute.xlu0 %1365 }
 0xf32   :  { %1568 = vmatmul.mubr.msk.bf16.vlgmr.msra.gmra.mxu1 %vm255_vm2, %v1366_v8 }
 0xf35   :  { %v501_v39 = vpop.permute.xlu0 %500 }
 0xf36   :  { %1680 = vmatmul.mubr.msk.f32.vlgmr.msra.gmra.mxu0 %vm255_vm2, %v501_v39 }
 0xf37   :  { %1683 = vmatpush3.msra.mxu0 %v2211_v58  ;;  %1698 = vmatprep.mubr.msk.f32.mxu0 %vm1976_vm3, %v1973_v0 }
 0xf38   :  { %1684 = vmatprep.subr.mxu0 %v1973_v0 }
 0xf39   :  { %1685 = vmatpush3.msra.mxu0 %v2213_v59 }
 0xf3a   :  { %1686 = vmatprep.subr.mxu0 %v1973_v0 }
 0xf3b   :  { %1687 = vmatpush3.msra.mxu0 %v2217_v23 }
 0xf3c   :  { %1688 = vmatprep.subr.mxu0 %v1973_v0 }
 0xf3d   :  { %1689 = vmatpush3.msra.mxu0 %v2221_v24 }
 0xf3e   :  { %1690 = vmatprep.subr.mxu0 %v1973_v0 }
 0xf3f   :  { %1691 = vmatpush3.msra.mxu0 %v2225_v25 }
 0xf40   :  { %1692 = vmatprep.subr.mxu0 %v1973_v0 }
 0xf41   :  { %1693 = vmatpush3.msra.mxu0 %v2229_v26 }
 0xf42   :  { %1694 = vmatprep.subr.mxu0 %v1973_v0 }
 0xf43   :  { %1695 = vmatpush3.msra.mxu0 %v2237_v15 }
 0xf44   :  { %1696 = vmatprep.subr.mxu0 %v1973_v0 }
 0xf45   :  { %1697 = vmatpush3.msra.mxu0 %v2240_v3 }
 0xf46   :  { %1699 = vmatmul.mubr.msk.f32.vlgmr.msra.gmra.mxu0 %vm255_vm2, %v660_v45  ;;  %1701 = vmatprep.subr.mxu0 %v1973_v0 }
 0xf47   :  { %1702 = vmatpush3.msra.mxu0 %v2211_v58  ;;  %1717 = vmatprep.mubr.msk.f32.mxu0 %vm1976_vm3, %v1973_v0 }
 0xf48   :  { %1703 = vmatprep.subr.mxu0 %v1973_v0 }
 0xf49   :  { %1704 = vmatpush3.msra.mxu0 %v2213_v59 }
 0xf4a   :  { %1705 = vmatprep.subr.mxu0 %v1973_v0 }
 0xf4b   :  { %1706 = vmatpush3.msra.mxu0 %v2217_v23 }
 0xf4c   :  { %1707 = vmatprep.subr.mxu0 %v1973_v0 }
 0xf4d   :  { %1708 = vmatpush3.msra.mxu0 %v2221_v24 }
 0xf4e   :  { %1709 = vmatprep.subr.mxu0 %v1973_v0 }
 0xf4f   :  { %1710 = vmatpush3.msra.mxu0 %v2225_v25 }
 0xf50   :  { %1711 = vmatprep.subr.mxu0 %v1973_v0 }
 0xf51   :  { %1712 = vmatpush3.msra.mxu0 %v2229_v26 }
 0xf52   :  { %1713 = vmatprep.subr.mxu0 %v1973_v0 }
 0xf53   :  { %1714 = vmatpush3.msra.mxu0 %v2237_v15 }
 0xf54   :  { %1715 = vmatprep.subr.mxu0 %v1973_v0 }
 0xf55   :  { %1716 = vmatpush3.msra.mxu0 %v2240_v3 }
 0xf56   :  { %1718 = vmatmul.mubr.msk.f32.vlgmr.msra.gmra.mxu0 %vm255_vm2, %v812_v40  ;;  %1720 = vmatprep.subr.mxu0 %v1973_v0 }
 0xf57   :  { %1721 = vmatpush3.msra.mxu0 %v2211_v58  ;;  %1736 = vmatprep.mubr.msk.f32.mxu0 %vm1976_vm3, %v1973_v0 }
 0xf58   :  { %1722 = vmatprep.subr.mxu0 %v1973_v0 }
 0xf59   :  { %1723 = vmatpush3.msra.mxu0 %v2213_v59 }
 0xf5a   :  { %1724 = vmatprep.subr.mxu0 %v1973_v0 }
 0xf5b   :  { %1725 = vmatpush3.msra.mxu0 %v2217_v23 }
 0xf5c   :  { %1726 = vmatprep.subr.mxu0 %v1973_v0 }
 0xf5d   :  { %1727 = vmatpush3.msra.mxu0 %v2221_v24 }
 0xf5e   :  { %1728 = vmatprep.subr.mxu0 %v1973_v0 }
 0xf5f   :  { %1729 = vmatpush3.msra.mxu0 %v2225_v25 }
 0xf60   :  { %1730 = vmatprep.subr.mxu0 %v1973_v0 }
 0xf61   :  { %1731 = vmatpush3.msra.mxu0 %v2229_v26 }
 0xf62   :  { %1732 = vmatprep.subr.mxu0 %v1973_v0 }
 0xf63   :  { %1733 = vmatpush3.msra.mxu0 %v2237_v15 }
 0xf64   :  { %1734 = vmatprep.subr.mxu0 %v1973_v0 }
 0xf65   :  { %1735 = vmatpush3.msra.mxu0 %v2240_v3 }
 0xf66   :  { %1739 = vmatprep.subr.mxu0 %v1973_v0 }
 0xf6d   :  { %v411_v42 = vpop.f32.mrf.mxu0 }
 0xf6e   :  { %v412_v43 = vadd.f32 %v2347_v41, %v411_v42 }
 0xf6f   :  { %v1662_v44 = vpop.f32.mrf.mxu0 }
 0xf70   :  { %415 = vst [vmem:[%s2454_s7] sm:$0x3] %v412_v43 }
 0xff2   :  { %v1404_v22 = vpop.f32.mrf.mxu1 }
 0xff3   :  { %v1413_v46 = vrot.slane %v1404_v22, 2 }
 0xff4   :  { %v1406_v47 = vpop.f32.mrf.mxu1 }
 0xff5   :  { %v1417_v13 = vadd.f32 %v1413_v46, %v2150_v18  ;;  %v1414_v55 = vrot.slane %v1406_v47, 2 }
 0xff6   :  { %v570_v48 = vpop.f32.mrf.mxu0  ;;  %v1408_v49 = vpop.f32.mrf.mxu1 }
 0xff7   :  { %v1569_v51 = vmul.f32 -1.442695, %v1417_v13  ;;  %v571_v52 = vadd.f32 %v2347_v41, %v570_v48  ;;  %v1418_v56 = vadd.f32 %v1414_v55, %v2154_v35  ;;  %v968_v35 = vrot.slane %v2176_v17, 2 }
 0xff8   :  { %v1681_v53 = vpop.f32.mrf.mxu0  ;;  %v1409_v54 = vpop.f32.mrf.mxu1 }
 0xff9   :  { %1913 = vpow2.f32 %v1569_v51  ;;  %574 = vst [vmem:[%s2454_s7 + $0x2] sm:$0x3] %v571_v52  ;;  %v1570_v2 = vmul.f32 -1.442695, %v1418_v56 }
 0xffa   :  { %1915 = vtanh.f32 %v1418_v56 }
0x1006   :  { %v1914_v57 = vpop.eup %1913  ;;  %v729_v27 = vpop.f32.mrf.mxu0 }
0x1007   :  { %v1425_v28 = vadd.f32 1.0, %v1914_v57  ;;  %v730_v18 = vadd.f32 %v2347_v41, %v729_v27  ;;  %v1916_v30 = vpop.eup %1915 }
0x1008   :  { %v1700_v29 = vpop.f32.mrf.mxu0 }
0x1009   :  { %1917 = vrcp.f32 %v1425_v28  ;;  %733 = vst [vmem:[%s2454_s7 + $0x4] sm:$0x3] %v730_v18 }
0x100a   :  { %1919 = vpow2.f32 %v1570_v2 }
0x1016   :  { %v1918_v60 = vpop.eup %1917  ;;  %v881_v61 = vpop.f32.mrf.mxu0 }
0x1017   :  { %v882_v62 = vadd.f32 %v2347_v41, %v881_v61  ;;  %v1433_v63 = vmul.f32 %v1918_v60, %v1916_v30  ;;  %v1920_v4 = vpop.eup %1919  ;;  %v1432_v7 = vmul.f32 %v1918_v60, %v2257_v33 }
0x1018   :  { %v1719_v1 = vpop.f32.mrf.mxu0  ;;  %v1426_v6 = vadd.f32 1.0, %v1920_v4 }
0x1019   :  { %885 = vst [vmem:[%s2454_s7 + $0x6] sm:$0x3] %v882_v62  ;;  %1435 = vrot.lane.b32.xlu0 %v1433_v63, %s1974_s2 }
0x101a   :  { %1921 = vrcp.f32 %v1426_v6 }
0x101d   :  { %969 = vrot.lane.b32.xlu0 %v968_v35, %s1974_s2 }
0x1021   :  { %1287 = vrot.lane.b32.xlu0 %v1286_v10, %s1974_s2 }
0x1027   :  { %v1922_v17 = vpop.eup %1921 }
0x108b   :  { %v1436_v9 = vpop.permute.xlu0 %1435 }
0x108c   :  { %v1438_v12 = vadd.f32 %v1436_v9, %v1432_v7 }
0x108e   :  { %1923 = vtanh.f32 %v1438_v12 }
0x108f   :  { %v970_v14 = vpop.permute.xlu0 %969 }
0x1090   :  { %1737 = vmatmul.mubr.msk.f32.vlgmr.msra.gmra.mxu0 %vm255_vm2, %v970_v14 }
0x1091   :  { %1740 = vmatpush3.msra.mxu0 %v2211_v58  ;;  %1755 = vmatprep.mubr.msk.f32.mxu0 %vm1976_vm3, %v1973_v0 }
0x1092   :  { %1741 = vmatprep.subr.mxu0 %v1973_v0 }
0x1093   :  { %1742 = vmatpush3.msra.mxu0 %v2213_v59  ;;  %v1288_v31 = vpop.permute.xlu0 %1287 }
0x1094   :  { %1743 = vmatprep.subr.mxu0 %v1973_v0 }
0x1095   :  { %1744 = vmatpush3.msra.mxu0 %v2217_v23 }
0x1096   :  { %1745 = vmatprep.subr.mxu0 %v1973_v0 }
0x1097   :  { %1746 = vmatpush3.msra.mxu0 %v2221_v24 }
0x1098   :  { %1747 = vmatprep.subr.mxu0 %v1973_v0 }
0x1099   :  { %1748 = vmatpush3.msra.mxu0 %v2225_v25 }
0x109a   :  { %1749 = vmatprep.subr.mxu0 %v1973_v0 }
0x109b   :  { %v1924_v16 = vpop.eup %1923  ;;  %1750 = vmatpush3.msra.mxu0 %v2229_v26 }
0x109c   :  { %1751 = vmatprep.subr.mxu0 %v1973_v0  ;;  %v1440_v19 = vmul.f32 %v1924_v16, %v1922_v17 }
0x109d   :  { %1752 = vmatpush3.msra.mxu0 %v2237_v15 }
0x109e   :  { %1753 = vmatprep.subr.mxu0 %v1973_v0  ;;  %v1442_v20 = vrot.slane %v1440_v19, 6 }
0x109f   :  { %1754 = vmatpush3.msra.mxu0 %v2240_v3 }
0x10a0   :  { %1756 = vmatmul.mubr.msk.f32.vlgmr.msra.gmra.mxu0 %vm255_vm2, %v1129_v21  ;;  %1758 = vmatprep.subr.mxu0 %v1973_v0 }
0x10a1   :  { %1759 = vmatpush3.msra.mxu0 %v2211_v58  ;;  %1443 = vrot.lane.b32.xlu1 %v1442_v20, %s1974_s2 }
0x10a2   :  { %1760 = vmatprep.subr.mxu0 %v1973_v0  ;;  %1774 = vmatprep.mubr.msk.f32.mxu0 %vm1976_vm3, %v1973_v0 }
0x10a3   :  { %1761 = vmatpush3.msra.mxu0 %v2213_v59 }
0x10a4   :  { %1762 = vmatprep.subr.mxu0 %v1973_v0 }
0x10a5   :  { %1763 = vmatpush3.msra.mxu0 %v2217_v23 }
0x10a6   :  { %1764 = vmatprep.subr.mxu0 %v1973_v0 }
0x10a7   :  { %1765 = vmatpush3.msra.mxu0 %v2221_v24 }
0x10a8   :  { %1766 = vmatprep.subr.mxu0 %v1973_v0 }
0x10a9   :  { %1767 = vmatpush3.msra.mxu0 %v2225_v25 }
0x10aa   :  { %1768 = vmatprep.subr.mxu0 %v1973_v0 }
0x10ab   :  { %1769 = vmatpush3.msra.mxu0 %v2229_v26 }
0x10ac   :  { %1770 = vmatprep.subr.mxu0 %v1973_v0 }
0x10ad   :  { %1771 = vmatpush3.msra.mxu0 %v2237_v15 }
0x10ae   :  { %1772 = vmatprep.subr.mxu0 %v1973_v0 }
0x10af   :  { %1773 = vmatpush3.msra.mxu0 %v2240_v3 }
0x10b0   :  { %1775 = vmatmul.mubr.msk.f32.vlgmr.msra.gmra.mxu0 %vm255_vm2, %v1288_v31  ;;  %1777 = vmatprep.subr.mxu0 %v1973_v0 }
0x10b1   :  { %1778 = vmatpush3.msra.mxu0 %v2211_v58  ;;  %1793 = vmatprep.mubr.msk.f32.mxu0 %vm1976_vm3, %v1973_v0 }
0x10b2   :  { %1779 = vmatprep.subr.mxu0 %v1973_v0 }
0x10b3   :  { %1780 = vmatpush3.msra.mxu0 %v2213_v59 }
0x10b4   :  { %1781 = vmatprep.subr.mxu0 %v1973_v0 }
0x10b5   :  { %1782 = vmatpush3.msra.mxu0 %v2217_v23 }
0x10b6   :  { %1783 = vmatprep.subr.mxu0 %v1973_v0 }
0x10b7   :  { %1784 = vmatpush3.msra.mxu0 %v2221_v24 }
0x10b8   :  { %1785 = vmatprep.subr.mxu0 %v1973_v0 }
0x10b9   :  { %1786 = vmatpush3.msra.mxu0 %v2225_v25 }
0x10ba   :  { %1787 = vmatprep.subr.mxu0 %v1973_v0 }
0x10bb   :  { %1788 = vmatpush3.msra.mxu0 %v2229_v26 }
0x10bc   :  { %1789 = vmatprep.subr.mxu0 %v1973_v0 }
0x10bd   :  { %1790 = vmatpush3.msra.mxu0 %v2237_v15 }
0x10be   :  { %1791 = vmatprep.subr.mxu0 %v1973_v0 }
0x10bf   :  { %1792 = vmatpush3.msra.mxu0 %v2240_v3 }
0x1113   :  { %v1444_v58 = vpop.permute.xlu1 %1443 }
0x1114   :  { %1794 = vmatmul.mubr.msk.f32.vlgmr.msra.gmra.mxu0 %vm255_vm2, %v1444_v58 }
0x1150   :  { %v1039_v59 = vpop.f32.mrf.mxu0 }
0x1151   :  { %v1040_v23 = vadd.f32 %v2347_v41, %v1039_v59 }
0x1152   :  { %v1738_v24 = vpop.f32.mrf.mxu0 }
0x1153   :  { %1043 = vst [vmem:[%s2454_s7 + $0x8] sm:$0x3] %v1040_v23 }
0x1160   :  { %v1198_v25 = vpop.f32.mrf.mxu0 }
0x1161   :  { %v1199_v26 = vadd.f32 %v2347_v41, %v1198_v25 }
0x1162   :  { %v1757_v32 = vpop.f32.mrf.mxu0 }
0x1163   :  { %1202 = vst [vmem:[%s2454_s7 + $0xa] sm:$0x3] %v1199_v26 }
0x1170   :  { %v1357_v0 = vpop.f32.mrf.mxu0 }
0x1171   :  { %v1358_v15 = vadd.f32 %v2347_v41, %v1357_v0 }
0x1172   :  { %v1776_v3 = vpop.f32.mrf.mxu0 }
0x1173   :  { %1361 = vst [vmem:[%s2454_s7 + $0xc] sm:$0x3] %v1358_v15 }
0x11d4   :  { %v1513_v33 = vpop.f32.mrf.mxu0 }
0x11d5   :  { %v1514_v5 = vadd.f32 %v2347_v41, %v1513_v33 }
0x11d6   :  { %v1795_v11 = vpop.f32.mrf.mxu0 }
0x11d7   :  { %1517 = vst [vmem:[%s2454_s7 + $0xe] sm:$0x3] %v1514_v5 }
0x11d8   :  { %1522 = vsyncpa [#allocation3], 1 }
0x11d9   :  { %1523 = vsyncpa [#allocation5], 1 }

</bundles_post_ra>
